<compile_context>
chip_gen: v7x
topology: tpu7x:2x2x1
jax: 0.10.0
libtpu: 0.0.40
codegen_flags: <defaults>
</compile_context>

<pallas_src>
import functools
import math

import jax
import jax.numpy as jnp
from jax import lax
from jax.experimental import pallas as pl
from jax.experimental.pallas import tpu as pltpu


# Support fixed-point iterations for sparsemax.  Exact once the support
# stabilizes (at most |support changes|+1 iterations; >= S covers worst case
# for the toy S=8; typical attention distributions converge in a handful).
_SPARSEMAX_FP_ITERS = 10


# ----------------------------------------------------------------------------
# In-kernel helpers (traced inside the Pallas kernel)
# ----------------------------------------------------------------------------
def _layernorm(x, g, b, eps):
    mu = jnp.mean(x, axis=-1, keepdims=True)
    xc = x - mu
    var = jnp.mean(xc * xc, axis=-1, keepdims=True)
    return xc * lax.rsqrt(var + eps) * g + b


def _gelu_erf(x):
    # Exact erf-GELU (matches HF ACT2FN["gelu"]) via the Abramowitz–Stegun
    # 7.1.26 erf approximation (|err| < 1.5e-7); exp and the reciprocal both
    # go to the EUP slot, the polynomial stays f32 on the VPU.
    z = x * 0.7071067811865476
    az = jnp.abs(z)
    t = pl.reciprocal(1.0 + 0.3275911 * az, approx=True)
    poly = ((((1.061405429 * t - 1.453152027) * t + 1.421413741) * t
             - 0.284496736) * t + 0.254829592) * t
    erf_abs = 1.0 - poly * jnp.exp(-az * az)
    erf = jnp.where(z >= 0.0, erf_abs, -erf_abs)
    return 0.5 * x * (1.0 + erf)


def _sparsemax_rows(z):
    """Sparsemax over the last axis of a [Q, K] f32 matrix.

    Support fixed-point iteration: starting from tau0 = max(z) - 1 (which
    satisfies tau0 <= tau*), iterate
        tau <- (sum_{z_i > tau} z_i - 1) / |{z_i > tau}|.
    tau is monotone non-decreasing, bounded by tau*, and becomes EXACT as soon
    as the support set stops changing (the last update is itself the exact
    refinement on that support).  Memory-bounded O(Q*K) per iteration, no
    [Q,K,K] broadcast and no sort.
    """
    zmax = jnp.max(z, axis=-1, keepdims=True)
    tau0 = zmax - 1.0                       # sum(relu(z - tau0)) >= 1  =>  tau0 <= tau*

    def body(_, tau):
        supp = (z > tau).astype(jnp.float32)        # argmax always in support => count >= 1
        s = jnp.sum(z * supp, axis=-1, keepdims=True)
        c = jnp.sum(supp, axis=-1, keepdims=True)
        return (s - 1.0) / c

    tau = lax.fori_loop(0, _SPARSEMAX_FP_ITERS, body, tau0)
    return jnp.maximum(z - tau, 0.0)


# ----------------------------------------------------------------------------
# One full RoFormer encoder layer as a Pallas kernel
# grid = (batch, query_tile); K^T/V scratch persists across the query-tile axis.
# ----------------------------------------------------------------------------
def roformer_layer_kernel(num_heads, head_dim, eps, q_tile,
                          xf_ref, cosq_ref, sinq_ref, cosft_ref, sinft_ref,
                          wq_ref, bq_ref, wk_ref, bk_ref, wv_ref, bv_ref,
                          wo_ref, bo_ref, g1_ref, be1_ref,
                          wi_ref, bi_ref, wo2_ref, bo2_ref, g2_ref, be2_ref,
                          out_ref, krt_ref, v_ref, ctx_ref):
    hd, hd2 = head_dim, head_dim // 2

    # ---- K / V for the whole sequence: once per batch element ---------------
    @pl.when(pl.program_id(1) == 0)
    def _():
        xf_bf = xf_ref[0].astype(jnp.bfloat16)                      # [S, H]
        k = jnp.dot(xf_bf, wk_ref[...],
                    preferred_element_type=jnp.float32) + bk_ref[...]
        v = jnp.dot(xf_bf, wv_ref[...],
                    preferred_element_type=jnp.float32) + bv_ref[...]
        v_ref[...] = v.astype(jnp.bfloat16)
        k_t = k.T                                                   # [H, S]; one XLU transpose / batch elem
        cosft = cosft_ref[...]                                      # [hd2, S]
        sinft = sinft_ref[...]
        for h in range(num_heads):                                  # static unroll
            lo = h * hd
            a = k_t[lo:lo + hd2, :]
            b = k_t[lo + hd2:lo + hd, :]
            # Rotated K, stored transposed: rows [ra | rb] per head.
            krt_ref[lo:lo + hd, :] = jnp.concatenate(
                [a * cosft - b * sinft, b * cosft + a * sinft], axis=0
            ).astype(jnp.bfloat16)

    # ---- Query tile sliced out of the already-resident full-seq block -------
    row0 = pl.multiple_of(pl.program_id(1) * q_tile, q_tile)
    xq = xf_ref[0, pl.ds(row0, q_tile), :]                          # [TQ, H] f32

    # 1/sqrt(head_dim) is folded into wq / bq in the wrapper.
    q = jnp.dot(xq.astype(jnp.bfloat16), wq_ref[...],
                preferred_element_type=jnp.float32) + bq_ref[...]
    cosq = cosq_ref[...]                                            # [TQ, hd2]
    sinq = sinq_ref[...]

    # ---- Per-head attention (sparsemax); context written into VMEM scratch --
    for h in range(num_heads):                                      # static unroll
        lo = h * hd
        qa = q[:, lo:lo + hd2]
        qb = q[:, lo + hd2:lo + hd]
        qr = jnp.concatenate([qa * cosq - qb * sinq, qb * cosq + qa * sinq],
                             axis=-1).astype(jnp.bfloat16)          # [TQ, hd]
        scores = jnp.dot(qr, krt_ref[lo:lo + hd, :],                # NN matmul
                         preferred_element_type=jnp.float32)        # [TQ, S]
        probs = _sparsemax_rows(scores)                             # [TQ, S] f32
        ctx_ref[:, lo:lo + hd] = jnp.dot(
            probs.astype(jnp.bfloat16), v_ref[:, lo:lo + hd],
            preferred_element_type=jnp.float32).astype(jnp.bfloat16)

    # ---- Self-output: dense + residual + LayerNorm ---------------------------
    attn = jnp.dot(ctx_ref[...], wo_ref[...],
                   preferred_element_type=jnp.float32) + bo_ref[...]
    h1 = _layernorm(attn + xq, g1_ref[...], be1_ref[...], eps)

    # ---- Feed-forward: dense -> exact GELU -> dense + residual + LayerNorm ---
    inter = _gelu_erf(jnp.dot(h1.astype(jnp.bfloat16), wi_ref[...],
                              preferred_element_type=jnp.float32) + bi_ref[...])
    ffn = jnp.dot(inter.astype(jnp.bfloat16), wo2_ref[...],
                  preferred_element_type=jnp.float32) + bo2_ref[...]
    out_ref[0] = _layernorm(ffn + h1, g2_ref[...], be2_ref[...], eps)


# ----------------------------------------------------------------------------
# Per-generation defaults (query tile + VMEM budget)
# ----------------------------------------------------------------------------
def _tpu_tile_defaults(S):
    kind = ""
    try:
        kind = jax.devices()[0].device_kind.lower()
    except Exception:
        pass
    if "v7" in kind:
        # 64 MiB physical VMEM per TensorCore: keep the tile modest and leave
        # headroom for Mosaic internal scratch.
        cap, vmem = 256, 56 * 1024 * 1024
    elif any(t in kind for t in ("v5e", "v5 lite", "v6e", "v6 lite", "trillium")):
        # 128 MiB physical VMEM: larger tile amortizes weight residency and
        # grid-step overhead.
        cap, vmem = 512, 100 * 1024 * 1024
    else:
        cap, vmem = 256, 64 * 1024 * 1024
    q_tile = min(S, cap)
    while S % q_tile:
        q_tile //= 2
    return max(q_tile, 1), vmem


def roformer_layer_pallas(x, tables, p, num_heads, head_dim, eps,
                          q_tile=None, vmem_limit_bytes=None,
                          single_buffer_weights=None):
    B, S, H = x.shape
    hd2 = head_dim // 2
    cos_q, sin_q, cos_ft, sin_ft = tables       # [S,hd2] x2, [hd2,S] x2 (f32)

    dflt_tile, dflt_vmem = _tpu_tile_defaults(S)
    if q_tile is None:
        q_tile = dflt_tile
    if vmem_limit_bytes is None:
        vmem_limit_bytes = dflt_vmem
    assert S % q_tile == 0, "sequence length must be a multiple of the query tile"
    nq = S // q_tile

    kernel = functools.partial(roformer_layer_kernel, num_heads, head_dim, eps, q_tile)

    weight_args = (p["wq"], p["bq"], p["wk"], p["bk"], p["wv"], p["bv"],
                   p["wo"], p["bo"], p["g1"], p["be1"],
                   p["wi"], p["bi"], p["wo2"], p["bo2"], p["g2"], p["be2"])

    if single_buffer_weights is None:
        # Single-buffer the replicated blocks only when they are big enough to
        # matter (production sizes) — keeps the toy config maximally portable.
        rep_bytes = sum(int(a.size) * a.dtype.itemsize for a in weight_args)
        single_buffer_weights = rep_bytes > (8 * 1024 * 1024)

    def const_spec(a):
        nd = a.ndim
        idx = lambda b, q, nd=nd: (0,) * nd
        if single_buffer_weights:
            return pl.BlockSpec(a.shape, idx, pipeline_mode=pl.Buffered(1))
        return pl.BlockSpec(a.shape, idx)

    if single_buffer_weights:
        xf_spec = pl.BlockSpec((1, S, H), lambda b, q: (b, 0, 0),
                               pipeline_mode=pl.Buffered(1))
    else:
        xf_spec = pl.BlockSpec((1, S, H), lambda b, q: (b, 0, 0))

    in_specs = (
        [xf_spec,                                                # x: full sequence (also the query tile)
         pl.BlockSpec((q_tile, hd2), lambda b, q: (q, 0)),       # cos, query rows
         pl.BlockSpec((q_tile, hd2), lambda b, q: (q, 0)),       # sin, query rows
         const_spec(cos_ft),                                     # cos^T, all rows
         const_spec(sin_ft)]                                     # sin^T, all rows
        + [const_spec(a) for a in weight_args])

    return pl.pallas_call(
        kernel,
        out_shape=jax.ShapeDtypeStruct((B, S, H), jnp.float32),
        grid=(B, nq),
        in_specs=in_specs,
        out_specs=pl.BlockSpec((1, q_tile, H), lambda b, q: (b, q, 0)),
        scratch_shapes=[
            pltpu.VMEM((H, S), jnp.bfloat16),       # rotated K, transposed (full sequence)
            pltpu.VMEM((S, H), jnp.bfloat16),       # V (full sequence)
            pltpu.VMEM((q_tile, H), jnp.bfloat16),  # per-head context assembly
        ],
        compiler_params=pltpu.CompilerParams(
            dimension_semantics=("parallel", "arbitrary"),
            vmem_limit_bytes=vmem_limit_bytes,
        ),
    )(x, cos_q, sin_q, cos_ft, sin_ft, *weight_args)


# ----------------------------------------------------------------------------
# Plain-JAX glue: positional tables, weight permutation / casting, encoder loop
# ----------------------------------------------------------------------------
def sinusoidal_tables(seq_len, head_dim):
    # RoFormerSinusoidalPositionalEmbedding frequencies: 10000^(-2i/head_dim).
    inv_freq = 1.0 / (10000.0 ** (jnp.arange(0, head_dim, 2, dtype=jnp.float32) / head_dim))
    ang = jnp.arange(seq_len, dtype=jnp.float32)[:, None] * inv_freq[None, :]
    return jnp.sin(ang), jnp.cos(ang)            # (sin, cos), each [S, head_dim//2]


def _rope_column_perm(num_heads, head_dim):
    idx = []
    for h in range(num_heads):
        base = h * head_dim
        idx += [base + j for j in range(0, head_dim, 2)]   # even sub-dims first
        idx += [base + j for j in range(1, head_dim, 2)]   # then odd sub-dims
    return jnp.asarray(idx, dtype=jnp.int32)


def prepare_layer_params(p, num_heads, head_dim):
    """Permute Wq/Wk columns to the rotate-half layout (RoPE without any lane
    permutation inside the kernel), fold 1/sqrt(head_dim) into Wq/bq (it
    commutes with the rotation) and cast all matmul weights to bfloat16."""
    perm = _rope_column_perm(num_heads, head_dim)
    scale = 1.0 / math.sqrt(head_dim)
    bf = lambda a: a.astype(jnp.bfloat16)
    return {
        "wq": bf(p["wq"][:, perm] * scale), "bq": p["bq"][:, perm] * scale,
        "wk": bf(p["wk"][:, perm]), "bk": p["bk"][:, perm],
        "wv": bf(p["wv"]), "bv": p["bv"],
        "wo": bf(p["wo"]), "bo": p["bo"],
        "g1": p["g1"], "be1": p["be1"],
        "wi": bf(p["wi"]), "bi": p["bi"],
        "wo2": bf(p["wo2"]), "bo2": p["bo2"],
        "g2": p["g2"], "be2": p["be2"],
    }


def init_layer_params(key, H, I):
    ks = jax.random.split(key, 8)
    n = lambda k, s: 0.05 * jax.random.normal(k, s, jnp.float32)
    return {
        "wq": n(ks[0], (H, H)), "bq": n(ks[1], (1, H)),
        "wk": n(ks[2], (H, H)), "bk": n(ks[3], (1, H)),
        "wv": n(ks[4], (H, H)), "bv": n(ks[5], (1, H)),
        "wo": n(ks[6], (H, H)), "bo": n(ks[7], (1, H)),
        "g1": jnp.ones((1, H), jnp.float32), "be1": jnp.zeros((1, H), jnp.float32),
        "wi": n(jax.random.fold_in(key, 100), (H, I)),
        "bi": n(jax.random.fold_in(key, 101), (1, I)),
        "wo2": n(jax.random.fold_in(key, 102), (I, H)),
        "bo2": n(jax.random.fold_in(key, 103), (1, H)),
        "g2": jnp.ones((1, H), jnp.float32), "be2": jnp.zeros((1, H), jnp.float32),
    }


def roformer_encoder_pallas(x, layer_params, num_heads, head_dim, eps=1e-12,
                            q_tile=None, vmem_limit_bytes=None,
                            single_buffer_weights=None):
    S = x.shape[1]
    sin_tab, cos_tab = sinusoidal_tables(S, head_dim)
    # Query-row tables [S, hd2] + pre-transposed full-sequence tables [hd2, S]
    # (so the kernel's transposed-K RoPE needs no in-kernel cos/sin transpose).
    tables = (cos_tab, sin_tab, cos_tab.T, sin_tab.T)
    prepared = [prepare_layer_params(p, num_heads, head_dim) for p in layer_params]
    h = x
    for p in prepared:
        h = roformer_layer_pallas(h, tables, p, num_heads, head_dim, eps,
                                  q_tile=q_tile, vmem_limit_bytes=vmem_limit_bytes,
                                  single_buffer_weights=single_buffer_weights)
    return h


# ----------------------------------------------------------------------------
# Pure-JAX f32 reference (mirrors the PyTorch module) for the correctness check
# ----------------------------------------------------------------------------
def ref_sparsemax(z):
    K = z.shape[-1]
    zs = -jnp.sort(-z, axis=-1)
    ks = jnp.arange(1, K + 1, dtype=z.dtype)
    cs = jnp.cumsum(zs, axis=-1)
    cond = 1.0 + ks * zs > cs
    kz = jnp.sum(cond.astype(jnp.int32), axis=-1, keepdims=True)
    tau = (jnp.take_along_axis(cs, kz - 1, axis=-1) - 1.0) / kz.astype(z.dtype)
    return jnp.maximum(z - tau, 0.0)


def ref_encoder(x, layer_params, num_heads, head_dim, eps=1e-12):
    B, S, H = x.shape
    sin, cos = sinusoidal_tables(S, head_dim)
    sin4, cos4 = sin[None, None], cos[None, None]

    def rope(t):
        x1, x2 = t[..., 0::2], t[..., 1::2]
        return jnp.stack([x1 * cos4 - x2 * sin4, x2 * cos4 + x1 * sin4], axis=-1).reshape(t.shape)

    def ln(t, g, b):
        mu = jnp.mean(t, -1, keepdims=True)
        var = jnp.mean((t - mu) ** 2, -1, keepdims=True)
        return (t - mu) / jnp.sqrt(var + eps) * g[0] + b[0]

    h = x
    for p in layer_params:
        def split(t):
            return t.reshape(B, S, num_heads, head_dim).transpose(0, 2, 1, 3)
        q = rope(split(h @ p["wq"] + p["bq"][0]))
        k = rope(split(h @ p["wk"] + p["bk"][0]))
        v = split(h @ p["wv"] + p["bv"][0])
        scores = jnp.einsum("bhqd,bhkd->bhqk", q, k) / math.sqrt(head_dim)
        probs = ref_sparsemax(scores)
        ctx = jnp.einsum("bhqk,bhkd->bhqd", probs, v).transpose(0, 2, 1, 3).reshape(B, S, H)
        h1 = ln(ctx @ p["wo"] + p["bo"][0] + h, p["g1"], p["be1"])
        ff = jax.nn.gelu(h1 @ p["wi"] + p["bi"][0], approximate=False) @ p["wo2"] + p["bo2"][0]
        h = ln(ff + h1, p["g2"], p["be2"])
    return h


# ----------------------------------------------------------------------------
if __name__ == "__main__":
    # Small synthetic config: hidden_size=32, num_attention_heads=2,
    # intermediate_size=64, num_hidden_layers=2, seq_len=8, batch=2.
    B, S, H, NH, INTER, L = 2, 8, 32, 2, 64, 2
    HD = H // NH
    EPS = 1e-12

    key = jax.random.PRNGKey(0)
    kx, kp = jax.random.split(key)
    x = jax.random.normal(kx, (B, S, H), jnp.float32)
    layer_params = [init_layer_params(jax.random.fold_in(kp, i), H, INTER) for i in range(L)]

    out = roformer_encoder_pallas(x, layer_params, NH, HD, EPS)
    out = jax.block_until_ready(out)

    ref = jax.block_until_ready(ref_encoder(x, layer_params, NH, HD, EPS))
    assert out.shape == (B, S, H)
    assert bool(jnp.all(jnp.isfinite(out)))
    max_diff = float(jnp.max(jnp.abs(out - ref)))
    # Kernel runs matmuls in bf16 (f32 accumulation); reference is pure f32.
    assert jnp.allclose(out, ref, atol=2.5e-2, rtol=2.5e-2), max_diff

    print("KERNEL_OK")
</pallas_src>

<mosaic_0001>
module attributes {stable_mosaic.version = 11 : i64} {
  func.func @roformer_layer_kernel(%arg0: i32, %arg1: i32, %arg2: memref<1x8x32xf32, #tpu.memory_space<vmem>>, %arg3: memref<8x8xf32, #tpu.memory_space<vmem>>, %arg4: memref<8x8xf32, #tpu.memory_space<vmem>>, %arg5: memref<8x8xf32, #tpu.memory_space<vmem>>, %arg6: memref<8x8xf32, #tpu.memory_space<vmem>>, %arg7: memref<32x32xbf16, #tpu.memory_space<vmem>>, %arg8: memref<1x32xf32, #tpu.memory_space<vmem>>, %arg9: memref<32x32xbf16, #tpu.memory_space<vmem>>, %arg10: memref<1x32xf32, #tpu.memory_space<vmem>>, %arg11: memref<32x32xbf16, #tpu.memory_space<vmem>>, %arg12: memref<1x32xf32, #tpu.memory_space<vmem>>, %arg13: memref<32x32xbf16, #tpu.memory_space<vmem>>, %arg14: memref<1x32xf32, #tpu.memory_space<vmem>>, %arg15: memref<1x32xf32, #tpu.memory_space<vmem>>, %arg16: memref<1x32xf32, #tpu.memory_space<vmem>>, %arg17: memref<32x64xbf16, #tpu.memory_space<vmem>>, %arg18: memref<1x64xf32, #tpu.memory_space<vmem>>, %arg19: memref<64x32xbf16, #tpu.memory_space<vmem>>, %arg20: memref<1x32xf32, #tpu.memory_space<vmem>>, %arg21: memref<1x32xf32, #tpu.memory_space<vmem>>, %arg22: memref<1x32xf32, #tpu.memory_space<vmem>>, %arg23: memref<1x8x32xf32, #tpu.memory_space<vmem>>, %arg24: memref<32x8xbf16, #tpu.memory_space<vmem>>, %arg25: memref<8x32xbf16, #tpu.memory_space<vmem>>, %arg26: memref<8x32xbf16, #tpu.memory_space<vmem>>) attributes {dimension_semantics = [#tpu.dimension_semantics<parallel>, #tpu.dimension_semantics<arbitrary>], iteration_bounds = array<i64: 2, 1>, scalar_prefetch = 0 : i64, scratch_operands = 3 : i64, tpu.core_type = #tpu.core_type<tc>, window_params = [{transform_indices = @transform_0, window_bounds = array<i64: 1, 8, 32>}, {transform_indices = @transform_1, window_bounds = array<i64: 8, 8>}, {transform_indices = @transform_2, window_bounds = array<i64: 8, 8>}, {pipeline_mode = #tpu.pipeline_mode<synchronous>, transform_indices = @transform_3, window_bounds = array<i64: 8, 8>}, {pipeline_mode = #tpu.pipeline_mode<synchronous>, transform_indices = @transform_4, window_bounds = array<i64: 8, 8>}, {pipeline_mode = #tpu.pipeline_mode<synchronous>, transform_indices = @transform_5, window_bounds = array<i64: 32, 32>}, {pipeline_mode = #tpu.pipeline_mode<synchronous>, transform_indices = @transform_6, window_bounds = array<i64: 1, 32>}, {pipeline_mode = #tpu.pipeline_mode<synchronous>, transform_indices = @transform_7, window_bounds = array<i64: 32, 32>}, {pipeline_mode = #tpu.pipeline_mode<synchronous>, transform_indices = @transform_8, window_bounds = array<i64: 1, 32>}, {pipeline_mode = #tpu.pipeline_mode<synchronous>, transform_indices = @transform_9, window_bounds = array<i64: 32, 32>}, {pipeline_mode = #tpu.pipeline_mode<synchronous>, transform_indices = @transform_10, window_bounds = array<i64: 1, 32>}, {pipeline_mode = #tpu.pipeline_mode<synchronous>, transform_indices = @transform_11, window_bounds = array<i64: 32, 32>}, {pipeline_mode = #tpu.pipeline_mode<synchronous>, transform_indices = @transform_12, window_bounds = array<i64: 1, 32>}, {pipeline_mode = #tpu.pipeline_mode<synchronous>, transform_indices = @transform_13, window_bounds = array<i64: 1, 32>}, {pipeline_mode = #tpu.pipeline_mode<synchronous>, transform_indices = @transform_14, window_bounds = array<i64: 1, 32>}, {pipeline_mode = #tpu.pipeline_mode<synchronous>, transform_indices = @transform_15, window_bounds = array<i64: 32, 64>}, {pipeline_mode = #tpu.pipeline_mode<synchronous>, transform_indices = @transform_16, window_bounds = array<i64: 1, 64>}, {pipeline_mode = #tpu.pipeline_mode<synchronous>, transform_indices = @transform_17, window_bounds = array<i64: 64, 32>}, {pipeline_mode = #tpu.pipeline_mode<synchronous>, transform_indices = @transform_18, window_bounds = array<i64: 1, 32>}, {pipeline_mode = #tpu.pipeline_mode<synchronous>, transform_indices = @transform_19, window_bounds = array<i64: 1, 32>}, {pipeline_mode = #tpu.pipeline_mode<synchronous>, transform_indices = @transform_20, window_bounds = array<i64: 1, 32>}, {transform_indices = @transform_21, window_bounds = array<i64: 1, 8, 32>}]} {
    %c0_i32 = arith.constant 0 : i32
    %0 = arith.cmpi eq, %arg1, %c0_i32 : i32
    %1 = arith.extui %0 : i1 to i32
    %c0_i32_0 = arith.constant 0 : i32
    %2 = arith.cmpi ne, %1, %c0_i32_0 : i32
    scf.if %2 {
      %c0_87 = arith.constant 0 : index
      %c0_88 = arith.constant 0 : index
      %c0_89 = arith.constant 0 : index
      %176 = vector.load %arg2[%c0_87, %c0_88, %c0_89] : memref<1x8x32xf32, #tpu.memory_space<vmem>>, vector<1x8x32xf32>
      %177 = vector.shape_cast %176 : vector<1x8x32xf32> to vector<8x32xf32>
      %178 = arith.truncf %177 : vector<8x32xf32> to vector<8x32xbf16>
      %c0_90 = arith.constant 0 : index
      %c0_91 = arith.constant 0 : index
      %179 = vector.load %arg9[%c0_90, %c0_91] : memref<32x32xbf16, #tpu.memory_space<vmem>>, vector<32x32xbf16>
      %cst_92 = arith.constant dense<0.000000e+00> : vector<8x32xf32>
      %180 = tpu.matmul %178, %179, %cst_92 {dimension_numbers = #tpu.dot_dimension_numbers<[1], [0], [0], [1], [0, 0, 1, 1], [], []>} : vector<8x32xbf16>, vector<32x32xbf16>, vector<8x32xf32> -> vector<8x32xf32>
      %c0_93 = arith.constant 0 : index
      %c0_94 = arith.constant 0 : index
      %181 = vector.load %arg10[%c0_93, %c0_94] : memref<1x32xf32, #tpu.memory_space<vmem>>, vector<1x32xf32>
      %182 = vector.broadcast %181 : vector<1x32xf32> to vector<8x32xf32>
      %183 = arith.addf %180, %182 : vector<8x32xf32>
      %c0_95 = arith.constant 0 : index
      %c0_96 = arith.constant 0 : index
      %184 = vector.load %arg11[%c0_95, %c0_96] : memref<32x32xbf16, #tpu.memory_space<vmem>>, vector<32x32xbf16>
      %cst_97 = arith.constant dense<0.000000e+00> : vector<8x32xf32>
      %185 = tpu.matmul %178, %184, %cst_97 {dimension_numbers = #tpu.dot_dimension_numbers<[1], [0], [0], [1], [0, 0, 1, 1], [], []>} : vector<8x32xbf16>, vector<32x32xbf16>, vector<8x32xf32> -> vector<8x32xf32>
      %c0_98 = arith.constant 0 : index
      %c0_99 = arith.constant 0 : index
      %186 = vector.load %arg12[%c0_98, %c0_99] : memref<1x32xf32, #tpu.memory_space<vmem>>, vector<1x32xf32>
      %187 = vector.broadcast %186 : vector<1x32xf32> to vector<8x32xf32>
      %188 = arith.addf %185, %187 : vector<8x32xf32>
      %189 = arith.truncf %188 : vector<8x32xf32> to vector<8x32xbf16>
      %c0_100 = arith.constant 0 : index
      %c0_101 = arith.constant 0 : index
      %190 = vector.load %arg25[%c0_100, %c0_101] : memref<8x32xbf16, #tpu.memory_space<vmem>>, vector<8x32xbf16>
      tpu.vector_store %arg25[%c0_100, %c0_101], %189 {strides = array<i32>} : memref<8x32xbf16, #tpu.memory_space<vmem>>, vector<8x32xbf16>,
      %191 = tpu.transpose %183, [1, 0] : vector<8x32xf32> -> vector<32x8xf32>
      %c0_102 = arith.constant 0 : index
      %c0_103 = arith.constant 0 : index
      %192 = vector.load %arg5[%c0_102, %c0_103] : memref<8x8xf32, #tpu.memory_space<vmem>>, vector<8x8xf32>
      %c0_104 = arith.constant 0 : index
      %c0_105 = arith.constant 0 : index
      %193 = vector.load %arg6[%c0_104, %c0_105] : memref<8x8xf32, #tpu.memory_space<vmem>>, vector<8x8xf32>
      %194 = vector.extract_strided_slice %191 {offsets = [0, 0], sizes = [8, 8], strides = [1, 1]} : vector<32x8xf32> to vector<8x8xf32>
      %195 = vector.extract_strided_slice %191 {offsets = [8, 0], sizes = [8, 8], strides = [1, 1]} : vector<32x8xf32> to vector<8x8xf32>
      %196 = arith.mulf %194, %192 : vector<8x8xf32>
      %197 = arith.mulf %195, %193 : vector<8x8xf32>
      %198 = arith.subf %196, %197 : vector<8x8xf32>
      %199 = arith.mulf %195, %192 : vector<8x8xf32>
      %200 = arith.mulf %194, %193 : vector<8x8xf32>
      %201 = arith.addf %199, %200 : vector<8x8xf32>
      %202 = tpu.concatenate %198, %201 in 0 : vector<8x8xf32>, vector<8x8xf32> -> vector<16x8xf32>
      %203 = arith.truncf %202 : vector<16x8xf32> to vector<16x8xbf16>
      %c0_106 = arith.constant 0 : index
      %c0_107 = arith.constant 0 : index
      %204 = vector.load %arg24[%c0_106, %c0_107] : memref<32x8xbf16, #tpu.memory_space<vmem>>, vector<16x8xbf16>
      tpu.vector_store %arg24[%c0_106, %c0_107], %203 {strides = array<i32>} : memref<32x8xbf16, #tpu.memory_space<vmem>>, vector<16x8xbf16>,
      %205 = vector.extract_strided_slice %191 {offsets = [16, 0], sizes = [8, 8], strides = [1, 1]} : vector<32x8xf32> to vector<8x8xf32>
      %206 = vector.extract_strided_slice %191 {offsets = [24, 0], sizes = [8, 8], strides = [1, 1]} : vector<32x8xf32> to vector<8x8xf32>
      %207 = arith.mulf %205, %192 : vector<8x8xf32>
      %208 = arith.mulf %206, %193 : vector<8x8xf32>
      %209 = arith.subf %207, %208 : vector<8x8xf32>
      %210 = arith.mulf %206, %192 : vector<8x8xf32>
      %211 = arith.mulf %205, %193 : vector<8x8xf32>
      %212 = arith.addf %210, %211 : vector<8x8xf32>
      %213 = tpu.concatenate %209, %212 in 0 : vector<8x8xf32>, vector<8x8xf32> -> vector<16x8xf32>
      %214 = arith.truncf %213 : vector<16x8xf32> to vector<16x8xbf16>
      %c16_108 = arith.constant 16 : index
      %c0_109 = arith.constant 0 : index
      %215 = vector.load %arg24[%c16_108, %c0_109] : memref<32x8xbf16, #tpu.memory_space<vmem>>, vector<16x8xbf16>
      tpu.vector_store %arg24[%c16_108, %c0_109], %214 {strides = array<i32>} : memref<32x8xbf16, #tpu.memory_space<vmem>>, vector<16x8xbf16>,
    } else {
    }
    %c8_i32 = arith.constant 8 : i32
    %3 = arith.muli %arg1, %c8_i32 : i32
    %4 = tpu.assume_multiple %3, 8 : i32
    %c0 = arith.constant 0 : index
    %5 = arith.index_cast %4 : i32 to index
    %c0_1 = arith.constant 0 : index
    %6 = vector.load %arg2[%c0, %5, %c0_1] : memref<1x8x32xf32, #tpu.memory_space<vmem>>, vector<1x8x32xf32>
    %7 = vector.shape_cast %6 : vector<1x8x32xf32> to vector<8x32xf32>
    %8 = arith.truncf %7 : vector<8x32xf32> to vector<8x32xbf16>
    %c0_2 = arith.constant 0 : index
    %c0_3 = arith.constant 0 : index
    %9 = vector.load %arg7[%c0_2, %c0_3] : memref<32x32xbf16, #tpu.memory_space<vmem>>, vector<32x32xbf16>
    %cst = arith.constant dense<0.000000e+00> : vector<8x32xf32>
    %10 = tpu.matmul %8, %9, %cst {dimension_numbers = #tpu.dot_dimension_numbers<[1], [0], [0], [1], [0, 0, 1, 1], [], []>} : vector<8x32xbf16>, vector<32x32xbf16>, vector<8x32xf32> -> vector<8x32xf32>
    %c0_4 = arith.constant 0 : index
    %c0_5 = arith.constant 0 : index
    %11 = vector.load %arg8[%c0_4, %c0_5] : memref<1x32xf32, #tpu.memory_space<vmem>>, vector<1x32xf32>
    %12 = vector.broadcast %11 : vector<1x32xf32> to vector<8x32xf32>
    %13 = arith.addf %10, %12 : vector<8x32xf32>
    %c0_6 = arith.constant 0 : index
    %c0_7 = arith.constant 0 : index
    %14 = vector.load %arg3[%c0_6, %c0_7] : memref<8x8xf32, #tpu.memory_space<vmem>>, vector<8x8xf32>
    %c0_8 = arith.constant 0 : index
    %c0_9 = arith.constant 0 : index
    %15 = vector.load %arg4[%c0_8, %c0_9] : memref<8x8xf32, #tpu.memory_space<vmem>>, vector<8x8xf32>
    %16 = vector.extract_strided_slice %13 {offsets = [0, 0], sizes = [8, 8], strides = [1, 1]} : vector<8x32xf32> to vector<8x8xf32>
    %17 = vector.extract_strided_slice %13 {offsets = [0, 8], sizes = [8, 8], strides = [1, 1]} : vector<8x32xf32> to vector<8x8xf32>
    %18 = arith.mulf %16, %14 : vector<8x8xf32>
    %19 = arith.mulf %17, %15 : vector<8x8xf32>
    %20 = arith.subf %18, %19 : vector<8x8xf32>
    %21 = arith.mulf %17, %14 : vector<8x8xf32>
    %22 = arith.mulf %16, %15 : vector<8x8xf32>
    %23 = arith.addf %21, %22 : vector<8x8xf32>
    %24 = tpu.concatenate %20, %23 in 1 : vector<8x8xf32>, vector<8x8xf32> -> vector<8x16xf32>
    %25 = arith.truncf %24 : vector<8x16xf32> to vector<8x16xbf16>
    %c0_10 = arith.constant 0 : index
    %c0_11 = arith.constant 0 : index
    %26 = vector.load %arg24[%c0_10, %c0_11] : memref<32x8xbf16, #tpu.memory_space<vmem>>, vector<16x8xbf16>
    %cst_12 = arith.constant dense<0.000000e+00> : vector<8x8xf32>
    %27 = tpu.matmul %25, %26, %cst_12 {dimension_numbers = #tpu.dot_dimension_numbers<[1], [0], [0], [1], [0, 0, 1, 1], [], []>} : vector<8x16xbf16>, vector<16x8xbf16>, vector<8x8xf32> -> vector<8x8xf32>
    %cst_13 = arith.constant dense<0xFF800000> : vector<8xf32>
    %28 = vector.multi_reduction <maximumf>, %27, %cst_13 [1] : vector<8x8xf32> to vector<8xf32>
    %29 = vector.shape_cast %28 : vector<8xf32> to vector<8x1xf32>
    %cst_14 = arith.constant 1.000000e+00 : f32
    %30 = vector.broadcast %cst_14 : f32 to vector<8x1xf32>
    %31 = arith.subf %29, %30 : vector<8x1xf32>
    %c0_i32_15 = arith.constant 0 : i32
    %c10_i32 = arith.constant 10 : i32
    %32 = arith.addi %c0_i32_15, %c10_i32 : i32
    %c1_i32 = arith.constant 1 : i32
    %33 = scf.for %arg27 = %c0_i32_15 to %32 step %c1_i32 iter_args(%arg28 = %31) -> (vector<8x1xf32>)  : i32 {
      %176 = vector.broadcast %arg28 : vector<8x1xf32> to vector<8x8xf32>
      %177 = arith.cmpf ogt, %27, %176 : vector<8x8xf32>
      %178 = arith.extui %177 : vector<8x8xi1> to vector<8x8xi32>
      %179 = arith.sitofp %178 : vector<8x8xi32> to vector<8x8xf32>
      %180 = arith.mulf %27, %179 : vector<8x8xf32>
      %cst_87 = arith.constant dense<0.000000e+00> : vector<8xf32>
      %181 = vector.multi_reduction <add>, %180, %cst_87 [1] : vector<8x8xf32> to vector<8xf32>
      %182 = vector.shape_cast %181 : vector<8xf32> to vector<8x1xf32>
      %cst_88 = arith.constant dense<0.000000e+00> : vector<8xf32>
      %183 = vector.multi_reduction <add>, %179, %cst_88 [1] : vector<8x8xf32> to vector<8xf32>
      %184 = vector.shape_cast %183 : vector<8xf32> to vector<8x1xf32>
      %cst_89 = arith.constant 1.000000e+00 : f32
      %185 = vector.broadcast %cst_89 : f32 to vector<8x1xf32>
      %186 = arith.subf %182, %185 : vector<8x1xf32>
      %187 = arith.divf %186, %184 : vector<8x1xf32>
      scf.yield %187 : vector<8x1xf32>
    }
    %34 = vector.broadcast %33 : vector<8x1xf32> to vector<8x8xf32>
    %35 = arith.subf %27, %34 : vector<8x8xf32>
    %cst_16 = arith.constant 0.000000e+00 : f32
    %36 = vector.broadcast %cst_16 : f32 to vector<8x8xf32>
    %37 = arith.maximumf %35, %36 : vector<8x8xf32>
    %38 = arith.truncf %37 : vector<8x8xf32> to vector<8x8xbf16>
    %c0_17 = arith.constant 0 : index
    %c0_18 = arith.constant 0 : index
    %39 = vector.load %arg25[%c0_17, %c0_18] : memref<8x32xbf16, #tpu.memory_space<vmem>>, vector<8x16xbf16>
    %cst_19 = arith.constant dense<0.000000e+00> : vector<8x16xf32>
    %40 = tpu.matmul %38, %39, %cst_19 {dimension_numbers = #tpu.dot_dimension_numbers<[1], [0], [0], [1], [0, 0, 1, 1], [], []>} : vector<8x8xbf16>, vector<8x16xbf16>, vector<8x16xf32> -> vector<8x16xf32>
    %41 = arith.truncf %40 : vector<8x16xf32> to vector<8x16xbf16>
    %c0_20 = arith.constant 0 : index
    %c0_21 = arith.constant 0 : index
    %42 = vector.load %arg26[%c0_20, %c0_21] : memref<8x32xbf16, #tpu.memory_space<vmem>>, vector<8x16xbf16>
    tpu.vector_store %arg26[%c0_20, %c0_21], %41 {strides = array<i32>} : memref<8x32xbf16, #tpu.memory_space<vmem>>, vector<8x16xbf16>,
    %43 = vector.extract_strided_slice %13 {offsets = [0, 16], sizes = [8, 8], strides = [1, 1]} : vector<8x32xf32> to vector<8x8xf32>
    %44 = vector.extract_strided_slice %13 {offsets = [0, 24], sizes = [8, 8], strides = [1, 1]} : vector<8x32xf32> to vector<8x8xf32>
    %45 = arith.mulf %43, %14 : vector<8x8xf32>
    %46 = arith.mulf %44, %15 : vector<8x8xf32>
    %47 = arith.subf %45, %46 : vector<8x8xf32>
    %48 = arith.mulf %44, %14 : vector<8x8xf32>
    %49 = arith.mulf %43, %15 : vector<8x8xf32>
    %50 = arith.addf %48, %49 : vector<8x8xf32>
    %51 = tpu.concatenate %47, %50 in 1 : vector<8x8xf32>, vector<8x8xf32> -> vector<8x16xf32>
    %52 = arith.truncf %51 : vector<8x16xf32> to vector<8x16xbf16>
    %c16 = arith.constant 16 : index
    %c0_22 = arith.constant 0 : index
    %53 = vector.load %arg24[%c16, %c0_22] : memref<32x8xbf16, #tpu.memory_space<vmem>>, vector<16x8xbf16>
    %cst_23 = arith.constant dense<0.000000e+00> : vector<8x8xf32>
    %54 = tpu.matmul %52, %53, %cst_23 {dimension_numbers = #tpu.dot_dimension_numbers<[1], [0], [0], [1], [0, 0, 1, 1], [], []>} : vector<8x16xbf16>, vector<16x8xbf16>, vector<8x8xf32> -> vector<8x8xf32>
    %cst_24 = arith.constant dense<0xFF800000> : vector<8xf32>
    %55 = vector.multi_reduction <maximumf>, %54, %cst_24 [1] : vector<8x8xf32> to vector<8xf32>
    %56 = vector.shape_cast %55 : vector<8xf32> to vector<8x1xf32>
    %cst_25 = arith.constant 1.000000e+00 : f32
    %57 = vector.broadcast %cst_25 : f32 to vector<8x1xf32>
    %58 = arith.subf %56, %57 : vector<8x1xf32>
    %c0_i32_26 = arith.constant 0 : i32
    %c10_i32_27 = arith.constant 10 : i32
    %59 = arith.addi %c0_i32_26, %c10_i32_27 : i32
    %c1_i32_28 = arith.constant 1 : i32
    %60 = scf.for %arg27 = %c0_i32_26 to %59 step %c1_i32_28 iter_args(%arg28 = %58) -> (vector<8x1xf32>)  : i32 {
      %176 = vector.broadcast %arg28 : vector<8x1xf32> to vector<8x8xf32>
      %177 = arith.cmpf ogt, %54, %176 : vector<8x8xf32>
      %178 = arith.extui %177 : vector<8x8xi1> to vector<8x8xi32>
      %179 = arith.sitofp %178 : vector<8x8xi32> to vector<8x8xf32>
      %180 = arith.mulf %54, %179 : vector<8x8xf32>
      %cst_87 = arith.constant dense<0.000000e+00> : vector<8xf32>
      %181 = vector.multi_reduction <add>, %180, %cst_87 [1] : vector<8x8xf32> to vector<8xf32>
      %182 = vector.shape_cast %181 : vector<8xf32> to vector<8x1xf32>
      %cst_88 = arith.constant dense<0.000000e+00> : vector<8xf32>
      %183 = vector.multi_reduction <add>, %179, %cst_88 [1] : vector<8x8xf32> to vector<8xf32>
      %184 = vector.shape_cast %183 : vector<8xf32> to vector<8x1xf32>
      %cst_89 = arith.constant 1.000000e+00 : f32
      %185 = vector.broadcast %cst_89 : f32 to vector<8x1xf32>
      %186 = arith.subf %182, %185 : vector<8x1xf32>
      %187 = arith.divf %186, %184 : vector<8x1xf32>
      scf.yield %187 : vector<8x1xf32>
    }
    %61 = vector.broadcast %60 : vector<8x1xf32> to vector<8x8xf32>
    %62 = arith.subf %54, %61 : vector<8x8xf32>
    %cst_29 = arith.constant 0.000000e+00 : f32
    %63 = vector.broadcast %cst_29 : f32 to vector<8x8xf32>
    %64 = arith.maximumf %62, %63 : vector<8x8xf32>
    %65 = arith.truncf %64 : vector<8x8xf32> to vector<8x8xbf16>
    %c0_30 = arith.constant 0 : index
    %c16_31 = arith.constant 16 : index
    %66 = vector.load %arg25[%c0_30, %c16_31] : memref<8x32xbf16, #tpu.memory_space<vmem>>, vector<8x16xbf16>
    %cst_32 = arith.constant dense<0.000000e+00> : vector<8x16xf32>
    %67 = tpu.matmul %65, %66, %cst_32 {dimension_numbers = #tpu.dot_dimension_numbers<[1], [0], [0], [1], [0, 0, 1, 1], [], []>} : vector<8x8xbf16>, vector<8x16xbf16>, vector<8x16xf32> -> vector<8x16xf32>
    %68 = arith.truncf %67 : vector<8x16xf32> to vector<8x16xbf16>
    %c0_33 = arith.constant 0 : index
    %c16_34 = arith.constant 16 : index
    %69 = vector.load %arg26[%c0_33, %c16_34] : memref<8x32xbf16, #tpu.memory_space<vmem>>, vector<8x16xbf16>
    tpu.vector_store %arg26[%c0_33, %c16_34], %68 {strides = array<i32>} : memref<8x32xbf16, #tpu.memory_space<vmem>>, vector<8x16xbf16>,
    %c0_35 = arith.constant 0 : index
    %c0_36 = arith.constant 0 : index
    %70 = vector.load %arg26[%c0_35, %c0_36] : memref<8x32xbf16, #tpu.memory_space<vmem>>, vector<8x32xbf16>
    %c0_37 = arith.constant 0 : index
    %c0_38 = arith.constant 0 : index
    %71 = vector.load %arg13[%c0_37, %c0_38] : memref<32x32xbf16, #tpu.memory_space<vmem>>, vector<32x32xbf16>
    %cst_39 = arith.constant dense<0.000000e+00> : vector<8x32xf32>
    %72 = tpu.matmul %70, %71, %cst_39 {dimension_numbers = #tpu.dot_dimension_numbers<[1], [0], [0], [1], [0, 0, 1, 1], [], []>} : vector<8x32xbf16>, vector<32x32xbf16>, vector<8x32xf32> -> vector<8x32xf32>
    %c0_40 = arith.constant 0 : index
    %c0_41 = arith.constant 0 : index
    %73 = vector.load %arg14[%c0_40, %c0_41] : memref<1x32xf32, #tpu.memory_space<vmem>>, vector<1x32xf32>
    %74 = vector.broadcast %73 : vector<1x32xf32> to vector<8x32xf32>
    %75 = arith.addf %72, %74 : vector<8x32xf32>
    %76 = arith.addf %75, %7 : vector<8x32xf32>
    %c0_42 = arith.constant 0 : index
    %c0_43 = arith.constant 0 : index
    %77 = vector.load %arg15[%c0_42, %c0_43] : memref<1x32xf32, #tpu.memory_space<vmem>>, vector<1x32xf32>
    %c0_44 = arith.constant 0 : index
    %c0_45 = arith.constant 0 : index
    %78 = vector.load %arg16[%c0_44, %c0_45] : memref<1x32xf32, #tpu.memory_space<vmem>>, vector<1x32xf32>
    %cst_46 = arith.constant dense<0.000000e+00> : vector<8xf32>
    %79 = vector.multi_reduction <add>, %76, %cst_46 [1] : vector<8x32xf32> to vector<8xf32>
    %80 = vector.shape_cast %79 : vector<8xf32> to vector<8x1xf32>
    %cst_47 = arith.constant 3.200000e+01 : f32
    %81 = vector.broadcast %cst_47 : f32 to vector<8x1xf32>
    %82 = arith.divf %80, %81 : vector<8x1xf32>
    %83 = vector.broadcast %82 : vector<8x1xf32> to vector<8x32xf32>
    %84 = arith.subf %76, %83 : vector<8x32xf32>
    %85 = arith.mulf %84, %84 : vector<8x32xf32>
    %cst_48 = arith.constant dense<0.000000e+00> : vector<8xf32>
    %86 = vector.multi_reduction <add>, %85, %cst_48 [1] : vector<8x32xf32> to vector<8xf32>
    %87 = vector.shape_cast %86 : vector<8xf32> to vector<8x1xf32>
    %cst_49 = arith.constant 3.200000e+01 : f32
    %88 = vector.broadcast %cst_49 : f32 to vector<8x1xf32>
    %89 = arith.divf %87, %88 : vector<8x1xf32>
    %cst_50 = arith.constant 9.99999996E-13 : f32
    %90 = vector.broadcast %cst_50 : f32 to vector<8x1xf32>
    %91 = arith.addf %89, %90 : vector<8x1xf32>
    %92 = math.rsqrt %91 : vector<8x1xf32>
    %93 = vector.broadcast %92 : vector<8x1xf32> to vector<8x32xf32>
    %94 = arith.mulf %84, %93 : vector<8x32xf32>
    %95 = vector.broadcast %77 : vector<1x32xf32> to vector<8x32xf32>
    %96 = arith.mulf %94, %95 : vector<8x32xf32>
    %97 = vector.broadcast %78 : vector<1x32xf32> to vector<8x32xf32>
    %98 = arith.addf %96, %97 : vector<8x32xf32>
    %99 = arith.truncf %98 : vector<8x32xf32> to vector<8x32xbf16>
    %c0_51 = arith.constant 0 : index
    %c0_52 = arith.constant 0 : index
    %100 = vector.load %arg17[%c0_51, %c0_52] : memref<32x64xbf16, #tpu.memory_space<vmem>>, vector<32x64xbf16>
    %cst_53 = arith.constant dense<0.000000e+00> : vector<8x64xf32>
    %101 = tpu.matmul %99, %100, %cst_53 {dimension_numbers = #tpu.dot_dimension_numbers<[1], [0], [0], [1], [0, 0, 1, 1], [], []>} : vector<8x32xbf16>, vector<32x64xbf16>, vector<8x64xf32> -> vector<8x64xf32>
    %c0_54 = arith.constant 0 : index
    %c0_55 = arith.constant 0 : index
    %102 = vector.load %arg18[%c0_54, %c0_55] : memref<1x64xf32, #tpu.memory_space<vmem>>, vector<1x64xf32>
    %103 = vector.broadcast %102 : vector<1x64xf32> to vector<8x64xf32>
    %104 = arith.addf %101, %103 : vector<8x64xf32>
    %cst_56 = arith.constant 0.707106769 : f32
    %105 = vector.broadcast %cst_56 : f32 to vector<8x64xf32>
    %106 = arith.mulf %104, %105 : vector<8x64xf32>
    %107 = math.absf %106 : vector<8x64xf32>
    %cst_57 = arith.constant 0.327591091 : f32
    %108 = vector.broadcast %cst_57 : f32 to vector<8x64xf32>
    %109 = arith.mulf %108, %107 : vector<8x64xf32>
    %cst_58 = arith.constant 1.000000e+00 : f32
    %110 = vector.broadcast %cst_58 : f32 to vector<8x64xf32>
    %111 = arith.addf %110, %109 : vector<8x64xf32>
    %112 = tpu.reciprocal %111 {approx = true} : vector<8x64xf32> -> vector<8x64xf32>
    %cst_59 = arith.constant 1.06140542 : f32
    %113 = vector.broadcast %cst_59 : f32 to vector<8x64xf32>
    %114 = arith.mulf %113, %112 : vector<8x64xf32>
    %cst_60 = arith.constant 1.45315206 : f32
    %115 = vector.broadcast %cst_60 : f32 to vector<8x64xf32>
    %116 = arith.subf %114, %115 : vector<8x64xf32>
    %117 = arith.mulf %116, %112 : vector<8x64xf32>
    %cst_61 = arith.constant 1.42141378 : f32
    %118 = vector.broadcast %cst_61 : f32 to vector<8x64xf32>
    %119 = arith.addf %117, %118 : vector<8x64xf32>
    %120 = arith.mulf %119, %112 : vector<8x64xf32>
    %cst_62 = arith.constant 0.284496725 : f32
    %121 = vector.broadcast %cst_62 : f32 to vector<8x64xf32>
    %122 = arith.subf %120, %121 : vector<8x64xf32>
    %123 = arith.mulf %122, %112 : vector<8x64xf32>
    %cst_63 = arith.constant 0.254829586 : f32
    %124 = vector.broadcast %cst_63 : f32 to vector<8x64xf32>
    %125 = arith.addf %123, %124 : vector<8x64xf32>
    %126 = arith.mulf %125, %112 : vector<8x64xf32>
    %cst_64 = arith.constant 0.000000e+00 : f32
    %127 = vector.broadcast %cst_64 : f32 to vector<8x64xf32>
    %128 = arith.subf %127, %107 : vector<8x64xf32>
    %129 = arith.mulf %128, %107 : vector<8x64xf32>
    %130 = math.exp %129 : vector<8x64xf32>
    %131 = arith.mulf %126, %130 : vector<8x64xf32>
    %cst_65 = arith.constant 1.000000e+00 : f32
    %132 = vector.broadcast %cst_65 : f32 to vector<8x64xf32>
    %133 = arith.subf %132, %131 : vector<8x64xf32>
    %cst_66 = arith.constant 0.000000e+00 : f32
    %134 = vector.broadcast %cst_66 : f32 to vector<8x64xf32>
    %135 = arith.cmpf oge, %106, %134 : vector<8x64xf32>
    %cst_67 = arith.constant 0.000000e+00 : f32
    %136 = vector.broadcast %cst_67 : f32 to vector<8x64xf32>
    %137 = arith.subf %136, %133 : vector<8x64xf32>
    %138 = arith.select %135, %133, %137 : vector<8x64xi1>, vector<8x64xf32>
    %cst_68 = arith.constant 5.000000e-01 : f32
    %139 = vector.broadcast %cst_68 : f32 to vector<8x64xf32>
    %140 = arith.mulf %139, %104 : vector<8x64xf32>
    %cst_69 = arith.constant 1.000000e+00 : f32
    %141 = vector.broadcast %cst_69 : f32 to vector<8x64xf32>
    %142 = arith.addf %141, %138 : vector<8x64xf32>
    %143 = arith.mulf %140, %142 : vector<8x64xf32>
    %144 = arith.truncf %143 : vector<8x64xf32> to vector<8x64xbf16>
    %c0_70 = arith.constant 0 : index
    %c0_71 = arith.constant 0 : index
    %145 = vector.load %arg19[%c0_70, %c0_71] : memref<64x32xbf16, #tpu.memory_space<vmem>>, vector<64x32xbf16>
    %cst_72 = arith.constant dense<0.000000e+00> : vector<8x32xf32>
    %146 = tpu.matmul %144, %145, %cst_72 {dimension_numbers = #tpu.dot_dimension_numbers<[1], [0], [0], [1], [0, 0, 1, 1], [], []>} : vector<8x64xbf16>, vector<64x32xbf16>, vector<8x32xf32> -> vector<8x32xf32>
    %c0_73 = arith.constant 0 : index
    %c0_74 = arith.constant 0 : index
    %147 = vector.load %arg20[%c0_73, %c0_74] : memref<1x32xf32, #tpu.memory_space<vmem>>, vector<1x32xf32>
    %148 = vector.broadcast %147 : vector<1x32xf32> to vector<8x32xf32>
    %149 = arith.addf %146, %148 : vector<8x32xf32>
    %150 = arith.addf %149, %98 : vector<8x32xf32>
    %c0_75 = arith.constant 0 : index
    %c0_76 = arith.constant 0 : index
    %151 = vector.load %arg21[%c0_75, %c0_76] : memref<1x32xf32, #tpu.memory_space<vmem>>, vector<1x32xf32>
    %c0_77 = arith.constant 0 : index
    %c0_78 = arith.constant 0 : index
    %152 = vector.load %arg22[%c0_77, %c0_78] : memref<1x32xf32, #tpu.memory_space<vmem>>, vector<1x32xf32>
    %cst_79 = arith.constant dense<0.000000e+00> : vector<8xf32>
    %153 = vector.multi_reduction <add>, %150, %cst_79 [1] : vector<8x32xf32> to vector<8xf32>
    %154 = vector.shape_cast %153 : vector<8xf32> to vector<8x1xf32>
    %cst_80 = arith.constant 3.200000e+01 : f32
    %155 = vector.broadcast %cst_80 : f32 to vector<8x1xf32>
    %156 = arith.divf %154, %155 : vector<8x1xf32>
    %157 = vector.broadcast %156 : vector<8x1xf32> to vector<8x32xf32>
    %158 = arith.subf %150, %157 : vector<8x32xf32>
    %159 = arith.mulf %158, %158 : vector<8x32xf32>
    %cst_81 = arith.constant dense<0.000000e+00> : vector<8xf32>
    %160 = vector.multi_reduction <add>, %159, %cst_81 [1] : vector<8x32xf32> to vector<8xf32>
    %161 = vector.shape_cast %160 : vector<8xf32> to vector<8x1xf32>
    %cst_82 = arith.constant 3.200000e+01 : f32
    %162 = vector.broadcast %cst_82 : f32 to vector<8x1xf32>
    %163 = arith.divf %161, %162 : vector<8x1xf32>
    %cst_83 = arith.constant 9.99999996E-13 : f32
    %164 = vector.broadcast %cst_83 : f32 to vector<8x1xf32>
    %165 = arith.addf %163, %164 : vector<8x1xf32>
    %166 = math.rsqrt %165 : vector<8x1xf32>
    %167 = vector.broadcast %166 : vector<8x1xf32> to vector<8x32xf32>
    %168 = arith.mulf %158, %167 : vector<8x32xf32>
    %169 = vector.broadcast %151 : vector<1x32xf32> to vector<8x32xf32>
    %170 = arith.mulf %168, %169 : vector<8x32xf32>
    %171 = vector.broadcast %152 : vector<1x32xf32> to vector<8x32xf32>
    %172 = arith.addf %170, %171 : vector<8x32xf32>
    %c0_84 = arith.constant 0 : index
    %c0_85 = arith.constant 0 : index
    %c0_86 = arith.constant 0 : index
    %173 = vector.load %arg23[%c0_84, %c0_85, %c0_86] : memref<1x8x32xf32, #tpu.memory_space<vmem>>, vector<1x8x32xf32>
    %174 = vector.shape_cast %173 : vector<1x8x32xf32> to vector<8x32xf32>
    %175 = vector.shape_cast %172 : vector<8x32xf32> to vector<1x8x32xf32>
    tpu.vector_store %arg23[%c0_84, %c0_85, %c0_86], %175 {strides = array<i32>} : memref<1x8x32xf32, #tpu.memory_space<vmem>>, vector<1x8x32xf32>,
    return
  }
  func.func @transform_0(%arg0: i32, %arg1: i32) -> (i32, i32, i32) {
    %c0_i32 = arith.constant 0 : i32
    %c0_i32_0 = arith.constant 0 : i32
    %c0_i32_1 = arith.constant 0 : i32
    return %arg0, %c0_i32, %c0_i32_0 : i32, i32, i32
  }
  func.func @transform_1(%arg0: i32, %arg1: i32) -> (i32, i32) {
    %c0_i32 = arith.constant 0 : i32
    %c0_i32_0 = arith.constant 0 : i32
    return %arg1, %c0_i32 : i32, i32
  }
  func.func @transform_2(%arg0: i32, %arg1: i32) -> (i32, i32) {
    %c0_i32 = arith.constant 0 : i32
    %c0_i32_0 = arith.constant 0 : i32
    return %arg1, %c0_i32 : i32, i32
  }
  func.func @transform_3(%arg0: i32, %arg1: i32) -> (i32, i32) {
    %c0_i32 = arith.constant 0 : i32
    %c0_i32_0 = arith.constant 0 : i32
    %c0_i32_1 = arith.constant 0 : i32
    return %c0_i32, %c0_i32_0 : i32, i32
  }
  func.func @transform_4(%arg0: i32, %arg1: i32) -> (i32, i32) {
    %c0_i32 = arith.constant 0 : i32
    %c0_i32_0 = arith.constant 0 : i32
    %c0_i32_1 = arith.constant 0 : i32
    return %c0_i32, %c0_i32_0 : i32, i32
  }
  func.func @transform_5(%arg0: i32, %arg1: i32) -> (i32, i32) {
    %c0_i32 = arith.constant 0 : i32
    %c0_i32_0 = arith.constant 0 : i32
    %c0_i32_1 = arith.constant 0 : i32
    return %c0_i32, %c0_i32_0 : i32, i32
  }
  func.func @transform_6(%arg0: i32, %arg1: i32) -> (i32, i32) {
    %c0_i32 = arith.constant 0 : i32
    %c0_i32_0 = arith.constant 0 : i32
    %c0_i32_1 = arith.constant 0 : i32
    return %c0_i32, %c0_i32_0 : i32, i32
  }
  func.func @transform_7(%arg0: i32, %arg1: i32) -> (i32, i32) {
    %c0_i32 = arith.constant 0 : i32
    %c0_i32_0 = arith.constant 0 : i32
    %c0_i32_1 = arith.constant 0 : i32
    return %c0_i32, %c0_i32_0 : i32, i32
  }
  func.func @transform_8(%arg0: i32, %arg1: i32) -> (i32, i32) {
    %c0_i32 = arith.constant 0 : i32
    %c0_i32_0 = arith.constant 0 : i32
    %c0_i32_1 = arith.constant 0 : i32
    return %c0_i32, %c0_i32_0 : i32, i32
  }
  func.func @transform_9(%arg0: i32, %arg1: i32) -> (i32, i32) {
    %c0_i32 = arith.constant 0 : i32
    %c0_i32_0 = arith.constant 0 : i32
    %c0_i32_1 = arith.constant 0 : i32
    return %c0_i32, %c0_i32_0 : i32, i32
  }
  func.func @transform_10(%arg0: i32, %arg1: i32) -> (i32, i32) {
    %c0_i32 = arith.constant 0 : i32
    %c0_i32_0 = arith.constant 0 : i32
    %c0_i32_1 = arith.constant 0 : i32
    return %c0_i32, %c0_i32_0 : i32, i32
  }
  func.func @transform_11(%arg0: i32, %arg1: i32) -> (i32, i32) {
    %c0_i32 = arith.constant 0 : i32
    %c0_i32_0 = arith.constant 0 : i32
    %c0_i32_1 = arith.constant 0 : i32
    return %c0_i32, %c0_i32_0 : i32, i32
  }
  func.func @transform_12(%arg0: i32, %arg1: i32) -> (i32, i32) {
    %c0_i32 = arith.constant 0 : i32
    %c0_i32_0 = arith.constant 0 : i32
    %c0_i32_1 = arith.constant 0 : i32
    return %c0_i32, %c0_i32_0 : i32, i32
  }
  func.func @transform_13(%arg0: i32, %arg1: i32) -> (i32, i32) {
    %c0_i32 = arith.constant 0 : i32
    %c0_i32_0 = arith.constant 0 : i32
    %c0_i32_1 = arith.constant 0 : i32
    return %c0_i32, %c0_i32_0 : i32, i32
  }
  func.func @transform_14(%arg0: i32, %arg1: i32) -> (i32, i32) {
    %c0_i32 = arith.constant 0 : i32
    %c0_i32_0 = arith.constant 0 : i32
    %c0_i32_1 = arith.constant 0 : i32
    return %c0_i32, %c0_i32_0 : i32, i32
  }
  func.func @transform_15(%arg0: i32, %arg1: i32) -> (i32, i32) {
    %c0_i32 = arith.constant 0 : i32
    %c0_i32_0 = arith.constant 0 : i32
    %c0_i32_1 = arith.constant 0 : i32
    return %c0_i32, %c0_i32_0 : i32, i32
  }
  func.func @transform_16(%arg0: i32, %arg1: i32) -> (i32, i32) {
    %c0_i32 = arith.constant 0 : i32
    %c0_i32_0 = arith.constant 0 : i32
    %c0_i32_1 = arith.constant 0 : i32
    return %c0_i32, %c0_i32_0 : i32, i32
  }
  func.func @transform_17(%arg0: i32, %arg1: i32) -> (i32, i32) {
    %c0_i32 = arith.constant 0 : i32
    %c0_i32_0 = arith.constant 0 : i32
    %c0_i32_1 = arith.constant 0 : i32
    return %c0_i32, %c0_i32_0 : i32, i32
  }
  func.func @transform_18(%arg0: i32, %arg1: i32) -> (i32, i32) {
    %c0_i32 = arith.constant 0 : i32
    %c0_i32_0 = arith.constant 0 : i32
    %c0_i32_1 = arith.constant 0 : i32
    return %c0_i32, %c0_i32_0 : i32, i32
  }
  func.func @transform_19(%arg0: i32, %arg1: i32) -> (i32, i32) {
    %c0_i32 = arith.constant 0 : i32
    %c0_i32_0 = arith.constant 0 : i32
    %c0_i32_1 = arith.constant 0 : i32
    return %c0_i32, %c0_i32_0 : i32, i32
  }
  func.func @transform_20(%arg0: i32, %arg1: i32) -> (i32, i32) {
    %c0_i32 = arith.constant 0 : i32
    %c0_i32_0 = arith.constant 0 : i32
    %c0_i32_1 = arith.constant 0 : i32
    return %c0_i32, %c0_i32_0 : i32, i32
  }
  func.func @transform_21(%arg0: i32, %arg1: i32) -> (i32, i32, i32) {
    %c0_i32 = arith.constant 0 : i32
    %c0_i32_0 = arith.constant 0 : i32
    return %arg0, %arg1, %c0_i32 : i32, i32, i32
  }
}

</mosaic_0001>

<bundles_post_ra>
// kernel: tpu_custom_call.1
= control target key start
LH: loop header
LB: loop body
LE: loop exit
PB: predicated region body
PF: predicated region fallthrough
CT: control target
= control target key end

     0   :  { %s4326_s0 = inlined_call_operand.hbm [shape: f32[2,8,32], index: 0, kind: input, shape index: {}]   ;;  %s4327_s1 = inlined_call_operand.hbm [shape: f32[8,8], index: 1, kind: input, shape index: {}]   ;;  %s4328_s2 = inlined_call_operand.hbm [shape: f32[8,8], index: 2, kind: input, shape index: {}]   ;;  %s4329_s3 = inlined_call_operand.hbm [shape: f32[8,8], index: 3, kind: input, shape index: {}]   ;;  %s4330_s4 = inlined_call_operand.hbm [shape: f32[8,8], index: 4, kind: input, shape index: {}]   ;;  %s4331_s5 = inlined_call_operand.hbm [shape: bf16[32,32], index: 5, kind: input, shape index: {}]   ;;  %s4332_s6 = inlined_call_operand.hbm [shape: f32[1,32], index: 6, kind: input, shape index: {}]   ;;  %s4333_s7 = inlined_call_operand.hbm [shape: bf16[32,32], index: 7, kind: input, shape index: {}]   ;;  %s4334_s8 = inlined_call_operand.hbm [shape: f32[1,32], index: 8, kind: input, shape index: {}]   ;;  %s4335_s9 = inlined_call_operand.hbm [shape: bf16[32,32], index: 9, kind: input, shape index: {}]   ;;  %s4336_s10 = inlined_call_operand.hbm [shape: f32[1,32], index: 10, kind: input, shape index: {}]   ;;  %s4337_s11 = inlined_call_operand.hbm [shape: bf16[32,32], index: 11, kind: input, shape index: {}]   ;;  %s4338_s12 = inlined_call_operand.hbm [shape: f32[1,32], index: 12, kind: input, shape index: {}]   ;;  %s4339_s13 = inlined_call_operand.hbm [shape: f32[1,32], index: 13, kind: input, shape index: {}]   ;;  %s4340_s14 = inlined_call_operand.hbm [shape: f32[1,32], index: 14, kind: input, shape index: {}]   ;;  %s4341_s15 = inlined_call_operand.hbm [shape: bf16[32,64], index: 15, kind: input, shape index: {}]   ;;  %s4342_s16 = inlined_call_operand.hbm [shape: f32[1,64], index: 16, kind: input, shape index: {}]   ;;  %s4343_s17 = inlined_call_operand.hbm [shape: bf16[64,32], index: 17, kind: input, shape index: {}]   ;;  %s4344_s18 = inlined_call_operand.hbm [shape: f32[1,32], index: 18, kind: input, shape index: {}]   ;;  %s4345_s19 = inlined_call_operand.hbm [shape: f32[1,32], index: 19, kind: input, shape index: {}]   ;;  %s4346_s20 = inlined_call_operand.hbm [shape: f32[1,32], index: 20, kind: input, shape index: {}]   ;;  %s4347_s21 = inlined_call_operand.hbm [shape: f32[2,8,32], index: 21, kind: output, shape index: {}]  }
   0x1   :  { %4376 = sst [smem:[#allocation59_spill]] %s4326_s0 }
   0x2   :  { %4377 = sst [smem:[#allocation60_spill]] %s4327_s1 }
   0x3   :  { %4378 = sst [smem:[#allocation61_spill]] %s4328_s2 }
   0x4   :  { %4379 = sst [smem:[#allocation62_spill]] %s4329_s3 }
   0x5   :  { %4380 = sst [smem:[#allocation63_spill]] %s4330_s4 }
   0x6   :  { %4381 = sst [smem:[#allocation64_spill]] %s4331_s5 }
   0x7   :  { %4382 = sst [smem:[#allocation65_spill]] %s4332_s6 }
   0x8   :  { %4383 = sst [smem:[#allocation66_spill]] %s4333_s7 }
   0x9   :  { %4384 = sst [smem:[#allocation67_spill]] %s4334_s8 }
   0xa   :  { %4385 = sst [smem:[#allocation68_spill]] %s4335_s9 }
   0xb   :  { %4386 = sst [smem:[#allocation69_spill]] %s4342_s16 }
   0xc   :  { %4387 = sst [smem:[#allocation70_spill]] %s4344_s18 }
   0xd   :  { %4388 = sst [smem:[#allocation71_spill]] %s4346_s20 }
   0xe   :  { %4389 = sst [smem:[#allocation72_spill]] %s4347_s21 }
   0xf   :  { %26 = vsyncpa [#allocation6], 0 }
  0x10   :  { %28 = vsyncpa [#allocation6 + $0x1], 0 }
  0x11   :  { %29 = vsyncpa [#allocation9], 0 }
  0x12   :  { %30 = vsyncpa [#allocation12], 0 }
  0x13   :  { %31 = vsyncpa [#allocation15], 0 }
  0x14   :  { %32 = vsyncpa [#allocation18], 0 }
  0x15   :  { %33 = vsyncpa [#allocation21], 0 }
  0x16   :  { %34 = vsyncpa [#allocation24], 0 }
  0x17   :  { %35 = vsyncpa [#allocation27], 0 }
  0x18   :  { %36 = vsyncpa [#allocation30], 0 }
  0x19   :  { %37 = vsyncpa [#allocation33], 0 }
  0x1a   :  { %38 = vsyncpa [#allocation36], 0 }
  0x1b   :  { %39 = vsyncpa [#allocation7], 0 }
  0x1c   :  { %41 = vsyncpa [#allocation7 + $0x1], 0  ;;  %s3583_s2 = smov 0   ;;  %s3585_s25 = smov 0  }
  0x1d   :  { %s3587_s26 = smov 0   ;;  %s3589_s27 = smov 0  }
  0x1e   :  { %s3591_s3 = smov 0   ;;  %s3593_s28 = smov 0  }
  0x1f LB: > { %4390 = sst [smem:[#allocation51_spill]] %s3402_s2  ;;  %s4354_s29 = sadd.s32 4294967295, %s3422_s28   ;;  %s3422_s28 = sphi %s3593_s28, %s47_s28   ;;  %s3418_s3 = sphi %s3591_s3, %s4448_s3   ;;  %s3414_s27 = sphi %s3589_s27, %s4447_s27   ;;  %s3410_s26 = sphi %s3587_s26, %s4062_s26   ;;  %s3406_s25 = sphi %s3585_s25, %s4446_s25   ;;  %s3402_s2 = sphi %s3583_s2, %s4445_s2  }
  0x20   : > { %4391 = sst [smem:[#allocation52_spill]] %s3406_s25  ;;  %p2156_p0 = scmp.ge.s32.totalorder %s3422_s28, 1 }
  0x21   : > { %4392 = sst [smem:[#allocation53_spill]] %s3410_s26  ;;  %p3617_p1 = scmp.eq.s32.totalorder %s4354_s29, 0 }
  0x22   : > { %4393 = sst [smem:[#allocation54_spill]] %s3414_s27  ;;  %p548_p2 = scmp.lt.s32.totalorder %s3422_s28, 3 }
  0x23   : > { %4394 = sst [smem:[#allocation55_spill]] %s3418_s3  ;;  %s3440_s30 = smov [#allocation8]  }
  0x24   : > { %4395 = sst [smem:[#allocation56_spill]] %s3422_s28  ;;  %p3622_p3 = pnand %p2156_p0, %p548_p2 }
  0x25   : > { %s4396_s0 = scalar_select %p3617_p1, 1, 0 }
  0x26   : > { %s4398_s4 = scalar_select %p3622_p3, 1, 0 }
  0x27   : > { %4397 = sst [smem:[#allocation57_spill]] %s4396_s0  ;;  %s563_s5 = sshll.u32 %s3440_s30, 4  ;;  %s564_s5 = int_to_ptr.vmem [resolvable:$true] %s563_s5 }
  0x28   : > { %4399 = sst [smem:[#allocation58_spill]] %s4398_s4  ;;  %p2440_p5 = pneg %p3622_p3 }
  0x29   : > { %s3441_s22 = smov [#allocation11]   ;;  %s3442_s24 = smov [#allocation14]  }
  0x2a   : > { %s587_s23 = sshll.u32 %s3441_s22, 4  ;;  %p3631_p6 = pnand %p2440_p5, %p3617_p1  ;;  %s3635_s23 = int_to_ptr.vmem [resolvable:$true] %s587_s23 }
  0x2b   : > { %s608_s29 = sshll.u32 %s3442_s24, 4  ;;  %s4401_s27 = sld [smem:[#allocation60_spill]]  ;;  %s3637_s29 = int_to_ptr.vmem [resolvable:$true] %s608_s29 }
  0x2c   : > { %p3647_p8 = pneg %p3631_p6 }
  0x31   : > { %s4402_s20 = smov %s4401_s27  ;;  %s2694_s2 = scalar_lea.hbm %s4401_s27, 128 }
  0x32   : > { %p2695_p7 = scmp.ne.s32.totalorder %s4402_s20, %s2694_s2  ;;  %p2701_p11 = scmp.lt.u32.totalorder %s2694_s2, %s4402_s20 }
  0x34   : > { %p2697_p9 = pnand %p3647_p8, %p2695_p7 }
  0x36   : > { %p2698_p10 = pneg %p2697_p9 }
  0x38   : > { %p2703_p12 = pnand %p2701_p11, %p2698_p10 }
  0x3a   : > { %2706 = shalt.err (!%p2703_p12)
}
  0x3b   : > { %s2707_s21 = scalar_lea.vmem %s564_s5, 128  ;;  %p2715_p5 = scmp.lt.s32.totalorder %s564_s5, %s564_s5 }
  0x3c   : > { %p2708_p13 = scmp.ne.s32.totalorder %s564_s5, %s2707_s21  ;;  %p2716_p4 = scmp.lt.s32.totalorder %s2707_s21, %s2707_s21 }
  0x3e   : > { %p2710_p0 = pnand %p2708_p13, %p3647_p8  ;;  %p2717_p3 = por %p2716_p4, %p2715_p5 }
  0x40   : > { %p2711_p2 = pneg %p2710_p0 }
  0x42   : > { %p2718_p1 = pnand %p2717_p3, %p2711_p2 }
  0x44   : > { %2721 = shalt.err (!%p2718_p1)
}
  0x45   : > { %2443 = dma.hbm_to_vmem [thread:$0]  (!%p3631_p6), %s4402_s20, 128, %s564_s5, [#allocation9]  }
  0x46   : > { %s4404_s4 = sld [smem:[#allocation62_spill]] }
  0x4c   : > { %s2722_s30 = scalar_lea.hbm %s4404_s4, 128 }
  0x4d   : > { %p2723_p7 = scmp.ne.s32.totalorder %s4404_s4, %s2722_s30  ;;  %p2729_p1 = scmp.lt.u32.totalorder %s2722_s30, %s4404_s4 }
  0x4f   : > { %p2725_p9 = pnand %p2723_p7, %p3647_p8 }
  0x51   : > { %p2726_p4 = pneg %p2725_p9 }
  0x53   : > { %p2731_p3 = pnand %p2729_p1, %p2726_p4 }
  0x55   : > { %2734 = shalt.err (!%p2731_p3)
}
  0x56   : > { %s2735_s5 = scalar_lea.vmem %s3635_s23, 128  ;;  %p2743_p13 = scmp.lt.s32.totalorder %s3635_s23, %s3635_s23 }
  0x57   : > { %p2736_p10 = scmp.ne.s32.totalorder %s3635_s23, %s2735_s5  ;;  %p2744_p0 = scmp.lt.s32.totalorder %s2735_s5, %s2735_s5 }
  0x59   : > { %p2738_p11 = pnand %p2736_p10, %p3647_p8  ;;  %p2745_p2 = por %p2744_p0, %p2743_p13 }
  0x5b   : > { %p2739_p12 = pneg %p2738_p11 }
  0x5d   : > { %p2746_p5 = pnand %p2745_p2, %p2739_p12 }
  0x5f   : > { %2749 = shalt.err (!%p2746_p5)
}
  0x60   : > { %2449 = dma.hbm_to_vmem [thread:$0]  (!%p3631_p6), %s4404_s4, 128, %s3635_s23, [#allocation12]  }
  0x61   : > { %s4405_s2 = sld [smem:[#allocation64_spill]] }
  0x67   : > { %s4406_s0 = smov %s4405_s2  ;;  %s2750_s30 = scalar_lea.hbm %s4405_s2, 256 }
  0x68   : > { %p2751_p7 = scmp.ne.s32.totalorder %s4406_s0, %s2750_s30  ;;  %p2757_p1 = scmp.lt.u32.totalorder %s2750_s30, %s4406_s0 }
  0x6a   : > { %p2753_p9 = pnand %p2751_p7, %p3647_p8 }
  0x6c   : > { %p2754_p4 = pneg %p2753_p9 }
  0x6e   : > { %p2759_p3 = pnand %p2757_p1, %p2754_p4 }
  0x70   : > { %2762 = shalt.err (!%p2759_p3)
}
  0x71   : > { %s2763_s23 = scalar_lea.vmem %s3637_s29, 256  ;;  %p2771_p13 = scmp.lt.s32.totalorder %s3637_s29, %s3637_s29 }
  0x72   : > { %p2764_p10 = scmp.ne.s32.totalorder %s3637_s29, %s2763_s23  ;;  %p2772_p0 = scmp.lt.s32.totalorder %s2763_s23, %s2763_s23 }
  0x74   : > { %p2766_p11 = pnand %p2764_p10, %p3647_p8  ;;  %p2773_p2 = por %p2772_p0, %p2771_p13 }
  0x76   : > { %p2767_p12 = pneg %p2766_p11 }
  0x78   : > { %p2774_p5 = pnand %p2773_p2, %p2767_p12 }
  0x7a   : > { %2777 = shalt.err (!%p2774_p5)
}
  0x7b   : > { %s3443_s26 = smov 64   ;;  %s3444_s20 = smov 4  }
  0x7c   : > { %2455 = dma.hbm_to_vmem [thread:$0]  (!%p3631_p6), %s4406_s0, 256, %s3637_s29, [#allocation15], %s3443_s26, %s3443_s26, %s3444_s20  }
  0x7d   : > { %s3445_s27 = smov [#allocation17]   ;;  %s3446_s30 = smov [#allocation20]  }
  0x7e   : > { %s632_s2 = sshll.u32 %s3445_s27, 4  ;;  %s656_s24 = sshll.u32 %s3446_s30, 4  ;;  %s633_s2 = int_to_ptr.vmem [resolvable:$true] %s632_s2  ;;  %s657_s24 = int_to_ptr.vmem [resolvable:$true] %s656_s24 }
  0x7f   : > { %s4407_s7 = sld [smem:[#allocation66_spill]] }
  0x85   : > { %s2778_s23 = scalar_lea.hbm %s4407_s7, 256 }
  0x86   : > { %p2779_p7 = scmp.ne.s32.totalorder %s4407_s7, %s2778_s23  ;;  %p2785_p1 = scmp.lt.u32.totalorder %s2778_s23, %s4407_s7 }
  0x88   : > { %p2781_p9 = pnand %p2779_p7, %p3647_p8 }
  0x8a   : > { %p2782_p4 = pneg %p2781_p9 }
  0x8c   : > { %p2787_p3 = pnand %p2785_p1, %p2782_p4 }
  0x8e   : > { %2790 = shalt.err (!%p2787_p3)
}
  0x8f   : > { %s2791_s29 = scalar_lea.vmem %s633_s2, 256  ;;  %p2799_p13 = scmp.lt.s32.totalorder %s633_s2, %s633_s2 }
  0x90   : > { %p2792_p10 = scmp.ne.s32.totalorder %s633_s2, %s2791_s29  ;;  %p2800_p0 = scmp.lt.s32.totalorder %s2791_s29, %s2791_s29 }
  0x92   : > { %p2794_p11 = pnand %p2792_p10, %p3647_p8  ;;  %p2801_p2 = por %p2800_p0, %p2799_p13 }
  0x94   : > { %p2795_p12 = pneg %p2794_p11 }
  0x96   : > { %p2802_p5 = pnand %p2801_p2, %p2795_p12 }
  0x98   : > { %2805 = shalt.err (!%p2802_p5)
}
  0x99   : > { %2461 = dma.hbm_to_vmem [thread:$0]  (!%p3631_p6), %s4407_s7, 256, %s633_s2, [#allocation18], %s3443_s26, %s3443_s26, %s3444_s20  }
  0x9a   : > { %s4408_s9 = sld [smem:[#allocation68_spill]] }
  0xa0   : > { %s2806_s3 = scalar_lea.hbm %s4408_s9, 256 }
  0xa1   : > { %p2807_p7 = scmp.ne.s32.totalorder %s4408_s9, %s2806_s3  ;;  %p2813_p1 = scmp.lt.u32.totalorder %s2806_s3, %s4408_s9 }
  0xa3   : > { %p2809_p9 = pnand %p2807_p7, %p3647_p8 }
  0xa5   : > { %p2810_p4 = pneg %p2809_p9 }
  0xa7   : > { %p2815_p3 = pnand %p2813_p1, %p2810_p4 }
  0xa9   : > { %2818 = shalt.err (!%p2815_p3)
}
  0xaa   : > { %s2819_s5 = scalar_lea.vmem %s657_s24, 256  ;;  %p2827_p13 = scmp.lt.s32.totalorder %s657_s24, %s657_s24 }
  0xab   : > { %p2820_p10 = scmp.ne.s32.totalorder %s657_s24, %s2819_s5  ;;  %p2828_p0 = scmp.lt.s32.totalorder %s2819_s5, %s2819_s5 }
  0xad   : > { %p2822_p11 = pnand %p2820_p10, %p3647_p8  ;;  %p2829_p2 = por %p2828_p0, %p2827_p13 }
  0xaf   : > { %p2823_p12 = pneg %p2822_p11 }
  0xb1   : > { %p2830_p5 = pnand %p2829_p2, %p2823_p12 }
  0xb3   : > { %2833 = shalt.err (!%p2830_p5)
}
  0xb4   : > { %2467 = dma.hbm_to_vmem [thread:$0]  (!%p3631_p6), %s4408_s9, 256, %s657_s24, [#allocation21], %s3443_s26, %s3443_s26, %s3444_s20  }
  0xb5   : > { %s3447_s29 = smov [#allocation23]   ;;  %s3448_s18 = smov [#allocation26]  }
  0xb6   : > { %s680_s16 = sshll.u32 %s3447_s29, 4  ;;  %s705_s28 = sshll.u32 %s3448_s18, 4  ;;  %s681_s16 = int_to_ptr.vmem [resolvable:$true] %s680_s16  ;;  %s706_s28 = int_to_ptr.vmem [resolvable:$true] %s705_s28 }
  0xb7   : > { %s2834_s25 = scalar_lea.hbm %s4337_s11, 256 }
  0xb8   : > { %p2835_p7 = scmp.ne.s32.totalorder %s4337_s11, %s2834_s25  ;;  %p2841_p1 = scmp.lt.u32.totalorder %s2834_s25, %s4337_s11 }
  0xba   : > { %p2837_p9 = pnand %p2835_p7, %p3647_p8 }
  0xbc   : > { %p2838_p4 = pneg %p2837_p9 }
  0xbe   : > { %p2843_p3 = pnand %p2841_p1, %p2838_p4 }
  0xc0   : > { %2846 = shalt.err (!%p2843_p3)
}
  0xc1   : > { %s2847_s24 = scalar_lea.vmem %s681_s16, 256  ;;  %p2855_p13 = scmp.lt.s32.totalorder %s681_s16, %s681_s16 }
  0xc2   : > { %p2848_p10 = scmp.ne.s32.totalorder %s681_s16, %s2847_s24  ;;  %p2856_p0 = scmp.lt.s32.totalorder %s2847_s24, %s2847_s24 }
  0xc4   : > { %p2850_p11 = pnand %p2848_p10, %p3647_p8  ;;  %p2857_p2 = por %p2856_p0, %p2855_p13 }
  0xc6   : > { %p2851_p12 = pneg %p2850_p11 }
  0xc8   : > { %p2858_p5 = pnand %p2857_p2, %p2851_p12 }
  0xca   : > { %2861 = shalt.err (!%p2858_p5)
}
  0xcb   : > { %2473 = dma.hbm_to_vmem [thread:$0]  (!%p3631_p6), %s4337_s11, 256, %s681_s16, [#allocation24], %s3443_s26, %s3443_s26, %s3444_s20  }
  0xcc   : > { %s2862_s4 = scalar_lea.hbm %s4339_s13, 16 }
  0xcd   : > { %p2863_p7 = scmp.ne.s32.totalorder %s4339_s13, %s2862_s4  ;;  %p2869_p1 = scmp.lt.u32.totalorder %s2862_s4, %s4339_s13 }
  0xcf   : > { %p2865_p9 = pnand %p2863_p7, %p3647_p8 }
  0xd1   : > { %p2866_p4 = pneg %p2865_p9 }
  0xd3   : > { %p2871_p3 = pnand %p2869_p1, %p2866_p4 }
  0xd5   : > { %2874 = shalt.err (!%p2871_p3)
}
  0xd6   : > { %s2875_s21 = scalar_lea.vmem %s706_s28, 16  ;;  %s2882_s16 = scalar_lea.vmem %s706_s28, 32 }
  0xd7   : > { %p2876_p10 = scmp.ne.s32.totalorder %s706_s28, %s2875_s21  ;;  %p2883_p13 = scmp.lt.s32.totalorder %s706_s28, %s706_s28 }
  0xd8   : > { %p2884_p0 = scmp.lt.s32.totalorder %s2882_s16, %s2875_s21 }
  0xd9   : > { %p2878_p11 = pnand %p2876_p10, %p3647_p8 }
  0xda   : > { %p2885_p2 = por %p2884_p0, %p2883_p13 }
  0xdb   : > { %p2879_p12 = pneg %p2878_p11 }
  0xdd   : > { %p2886_p5 = pnand %p2885_p2, %p2879_p12 }
  0xdf   : > { %2889 = shalt.err (!%p2886_p5)
}
  0xe0   : > { %2479 = dma.hbm_to_vmem [thread:$0]  (!%p3631_p6), %s4339_s13, 16, %s706_s28, [#allocation27]  }
  0xe1   : > { %s3449_s2 = smov [#allocation29]   ;;  %s3450_s29 = smov [#allocation32]  }
  0xe2   : > { %s726_s23 = sshll.u32 %s3449_s2, 4  ;;  %s750_s18 = sshll.u32 %s3450_s29, 4  ;;  %s727_s23 = int_to_ptr.vmem [resolvable:$true] %s726_s23  ;;  %s751_s18 = int_to_ptr.vmem [resolvable:$true] %s750_s18 }
  0xe3   : > { %s2890_s25 = scalar_lea.hbm %s4341_s15, 256 }
  0xe4   : > { %p2891_p7 = scmp.ne.s32.totalorder %s4341_s15, %s2890_s25  ;;  %p2897_p1 = scmp.lt.u32.totalorder %s2890_s25, %s4341_s15 }
  0xe6   : > { %p2893_p9 = pnand %p2891_p7, %p3647_p8 }
  0xe8   : > { %p2894_p4 = pneg %p2893_p9 }
  0xea   : > { %p2899_p3 = pnand %p2897_p1, %p2894_p4 }
  0xec   : > { %2902 = shalt.err (!%p2899_p3)
}
  0xed   : > { %s2903_s28 = scalar_lea.vmem %s727_s23, 256  ;;  %p2911_p13 = scmp.lt.s32.totalorder %s727_s23, %s727_s23 }
  0xee   : > { %p2904_p10 = scmp.ne.s32.totalorder %s727_s23, %s2903_s28  ;;  %p2912_p0 = scmp.lt.s32.totalorder %s2903_s28, %s2903_s28 }
  0xf0   : > { %p2906_p11 = pnand %p2904_p10, %p3647_p8  ;;  %p2913_p2 = por %p2912_p0, %p2911_p13 }
  0xf2   : > { %p2907_p12 = pneg %p2906_p11 }
  0xf4   : > { %p2914_p5 = pnand %p2913_p2, %p2907_p12 }
  0xf6   : > { %2917 = shalt.err (!%p2914_p5)
}
  0xf7   : > { %2485 = dma.hbm_to_vmem [thread:$0]  (!%p3631_p6), %s4341_s15, 256, %s727_s23, [#allocation30], %s3443_s26, %s3443_s26, %s3444_s20  }
  0xf8   : > { %s2918_s4 = scalar_lea.hbm %s4343_s17, 512 }
  0xf9   : > { %p2919_p7 = scmp.ne.s32.totalorder %s4343_s17, %s2918_s4  ;;  %p2925_p1 = scmp.lt.u32.totalorder %s2918_s4, %s4343_s17 }
  0xfb   : > { %p2921_p9 = pnand %p2919_p7, %p3647_p8 }
  0xfd   : > { %p2922_p4 = pneg %p2921_p9 }
  0xff   : > { %p2927_p3 = pnand %p2925_p1, %p2922_p4 }
 0x101   : > { %2930 = shalt.err (!%p2927_p3)
}
 0x102   : > { %s2931_s21 = scalar_lea.vmem %s751_s18, 512  ;;  %p2939_p13 = scmp.lt.s32.totalorder %s751_s18, %s751_s18 }
 0x103   : > { %p2932_p10 = scmp.ne.s32.totalorder %s751_s18, %s2931_s21  ;;  %p2940_p0 = scmp.lt.s32.totalorder %s2931_s21, %s2931_s21 }
 0x105   : > { %p2934_p11 = pnand %p2932_p10, %p3647_p8  ;;  %p2941_p2 = por %p2940_p0, %p2939_p13 }
 0x107   : > { %p2935_p12 = pneg %p2934_p11 }
 0x109   : > { %p2942_p5 = pnand %p2941_p2, %p2935_p12 }
 0x10b   : > { %2945 = shalt.err (!%p2942_p5)
}
 0x10c   : > { %2491 = dma.hbm_to_vmem [thread:$0]  (!%p3631_p6), %s4343_s17, 512, %s751_s18, [#allocation33], %s3443_s26, %s3443_s26, %s3444_s20  }
 0x10d   : > { %s3451_s28 = smov [#allocation35]   ;;  %s3452_s24 = smov [#allocation10]  }
 0x10e   : > { %s775_s5 = sshll.u32 %s3451_s28, 4  ;;  %s576_s2 = sshll.u32 %s3452_s24, 4  ;;  %s776_s5 = int_to_ptr.vmem [resolvable:$true] %s775_s5  ;;  %s577_s2 = int_to_ptr.vmem [resolvable:$true] %s576_s2 }
 0x10f   : > { %s2946_s3 = scalar_lea.hbm %s4345_s19, 16 }
 0x110   : > { %p2947_p7 = scmp.ne.s32.totalorder %s4345_s19, %s2946_s3  ;;  %p2953_p1 = scmp.lt.u32.totalorder %s2946_s3, %s4345_s19 }
 0x112   : > { %p2949_p9 = pnand %p2947_p7, %p3647_p8 }
 0x114   : > { %p2950_p4 = pneg %p2949_p9 }
 0x116   : > { %p2955_p3 = pnand %p2953_p1, %p2950_p4 }
 0x118   : > { %2958 = shalt.err (!%p2955_p3)
}
 0x119   : > { %s2959_s26 = scalar_lea.vmem %s776_s5, 16  ;;  %s2966_s20 = scalar_lea.vmem %s776_s5, 32 }
 0x11a   : > { %p2960_p10 = scmp.ne.s32.totalorder %s776_s5, %s2959_s26  ;;  %p2967_p13 = scmp.lt.s32.totalorder %s776_s5, %s776_s5 }
 0x11b   : > { %p2968_p0 = scmp.lt.s32.totalorder %s2966_s20, %s2959_s26 }
 0x11c   : > { %p2962_p11 = pnand %p2960_p10, %p3647_p8 }
 0x11d   : > { %p2969_p2 = por %p2968_p0, %p2967_p13 }
 0x11e   : > { %p2963_p12 = pneg %p2962_p11 }
 0x120   : > { %p2970_p5 = pnand %p2969_p2, %p2963_p12 }
 0x122   : > { %2973 = shalt.err (!%p2970_p5)
}
 0x123   : > { %2497 = dma.hbm_to_vmem [thread:$0]  (!%p3631_p6), %s4345_s19, 16, %s776_s5, [#allocation36]  }
 0x124   : > { %s4409_s24 = sld [smem:[#allocation61_spill]] }
 0x12a   : > { %s2974_s29 = scalar_lea.hbm %s4409_s24, 128 }
 0x12b   : > { %p2975_p7 = scmp.ne.s32.totalorder %s4409_s24, %s2974_s29  ;;  %p2981_p1 = scmp.lt.u32.totalorder %s2974_s29, %s4409_s24 }
 0x12d   : > { %p2977_p9 = pnand %p2975_p7, %p3647_p8 }
 0x12f   : > { %p2978_p4 = pneg %p2977_p9 }
 0x131   : > { %p2983_p3 = pnand %p2981_p1, %p2978_p4 }
 0x133   : > { %2986 = shalt.err (!%p2983_p3)
}
 0x134   : > { %s2987_s30 = scalar_lea.vmem %s577_s2, 128  ;;  %p2995_p13 = scmp.lt.s32.totalorder %s577_s2, %s577_s2 }
 0x135   : > { %p2988_p10 = scmp.ne.s32.totalorder %s577_s2, %s2987_s30  ;;  %p2996_p0 = scmp.lt.s32.totalorder %s2987_s30, %s2987_s30 }
 0x137   : > { %p2990_p11 = pnand %p2988_p10, %p3647_p8  ;;  %p2997_p2 = por %p2996_p0, %p2995_p13 }
 0x139   : > { %p2991_p12 = pneg %p2990_p11 }
 0x13b   : > { %p2998_p5 = pnand %p2997_p2, %p2991_p12 }
 0x13d   : > { %3001 = shalt.err (!%p2998_p5)
}
 0x13e   : > { %2446 = dma.hbm_to_vmem [thread:$0]  (!%p3631_p6), %s4409_s24, 128, %s577_s2, [#allocation9]  }
 0x13f   : > { %s3453_s26 = smov [#allocation13]   ;;  %s3454_s18 = smov [#allocation16]  }
 0x140   : > { %s598_s20 = sshll.u32 %s3453_s26, 4  ;;  %s622_s23 = sshll.u32 %s3454_s18, 4  ;;  %s599_s20 = int_to_ptr.vmem [resolvable:$true] %s598_s20  ;;  %s623_s23 = int_to_ptr.vmem [resolvable:$true] %s622_s23 }
 0x141   : > { %s4410_s29 = sld [smem:[#allocation63_spill]] }
 0x147   : > { %s3002_s4 = scalar_lea.hbm %s4410_s29, 128 }
 0x148   : > { %p3003_p7 = scmp.ne.s32.totalorder %s4410_s29, %s3002_s4  ;;  %p3009_p1 = scmp.lt.u32.totalorder %s3002_s4, %s4410_s29 }
 0x14a   : > { %p3005_p9 = pnand %p3003_p7, %p3647_p8 }
 0x14c   : > { %p3006_p4 = pneg %p3005_p9 }
 0x14e   : > { %p3011_p3 = pnand %p3009_p1, %p3006_p4 }
 0x150   : > { %3014 = shalt.err (!%p3011_p3)
}
 0x151   : > { %s3015_s2 = scalar_lea.vmem %s599_s20, 128  ;;  %p3023_p13 = scmp.lt.s32.totalorder %s599_s20, %s599_s20 }
 0x152   : > { %p3016_p10 = scmp.ne.s32.totalorder %s599_s20, %s3015_s2  ;;  %p3024_p0 = scmp.lt.s32.totalorder %s3015_s2, %s3015_s2 }
 0x154   : > { %p3018_p11 = pnand %p3016_p10, %p3647_p8  ;;  %p3025_p2 = por %p3024_p0, %p3023_p13 }
 0x156   : > { %p3019_p12 = pneg %p3018_p11 }
 0x158   : > { %p3026_p5 = pnand %p3025_p2, %p3019_p12 }
 0x15a   : > { %3029 = shalt.err (!%p3026_p5)
}
 0x15b   : > { %2452 = dma.hbm_to_vmem [thread:$0]  (!%p3631_p6), %s4410_s29, 128, %s599_s20, [#allocation12]  }
 0x15c   : > { %s4411_s6 = sld [smem:[#allocation65_spill]] }
 0x162   : > { %s3030_s16 = scalar_lea.hbm %s4411_s6, 16 }
 0x163   : > { %p3031_p7 = scmp.ne.s32.totalorder %s4411_s6, %s3030_s16  ;;  %p3037_p1 = scmp.lt.u32.totalorder %s3030_s16, %s4411_s6 }
 0x165   : > { %p3033_p9 = pnand %p3031_p7, %p3647_p8 }
 0x167   : > { %p3034_p4 = pneg %p3033_p9 }
 0x169   : > { %p3039_p3 = pnand %p3037_p1, %p3034_p4 }
 0x16b   : > { %3042 = shalt.err (!%p3039_p3)
}
 0x16c   : > { %s3043_s27 = scalar_lea.vmem %s623_s23, 16  ;;  %s3050_s20 = scalar_lea.vmem %s623_s23, 32 }
 0x16d   : > { %p3044_p10 = scmp.ne.s32.totalorder %s623_s23, %s3043_s27  ;;  %p3051_p13 = scmp.lt.s32.totalorder %s623_s23, %s623_s23 }
 0x16e   : > { %p3052_p0 = scmp.lt.s32.totalorder %s3050_s20, %s3043_s27 }
 0x16f   : > { %p3046_p11 = pnand %p3044_p10, %p3647_p8 }
 0x170   : > { %p3053_p2 = por %p3052_p0, %p3051_p13 }
 0x171   : > { %p3047_p12 = pneg %p3046_p11 }
 0x173   : > { %p3054_p5 = pnand %p3053_p2, %p3047_p12 }
 0x175   : > { %3057 = shalt.err (!%p3054_p5)
}
 0x176   : > { %2458 = dma.hbm_to_vmem [thread:$0]  (!%p3631_p6), %s4411_s6, 16, %s623_s23, [#allocation15]  }
 0x177   : > { %s3455_s5 = smov [#allocation19]   ;;  %s3456_s26 = smov [#allocation22]  }
 0x178   : > { %s646_s21 = sshll.u32 %s3455_s5, 4  ;;  %s670_s18 = sshll.u32 %s3456_s26, 4  ;;  %s647_s21 = int_to_ptr.vmem [resolvable:$true] %s646_s21  ;;  %s671_s18 = int_to_ptr.vmem [resolvable:$true] %s670_s18 }
 0x179   : > { %s4412_s8 = sld [smem:[#allocation67_spill]] }
 0x17f   : > { %s3058_s4 = scalar_lea.hbm %s4412_s8, 16 }
 0x180   : > { %p3059_p7 = scmp.ne.s32.totalorder %s4412_s8, %s3058_s4  ;;  %p3065_p1 = scmp.lt.u32.totalorder %s3058_s4, %s4412_s8 }
 0x182   : > { %p3061_p9 = pnand %p3059_p7, %p3647_p8 }
 0x184   : > { %p3062_p4 = pneg %p3061_p9 }
 0x186   : > { %p3067_p3 = pnand %p3065_p1, %p3062_p4 }
 0x188   : > { %3070 = shalt.err (!%p3067_p3)
}
 0x189   : > { %s3071_s23 = scalar_lea.vmem %s647_s21, 16  ;;  %s3078_s30 = scalar_lea.vmem %s647_s21, 32 }
 0x18a   : > { %p3072_p10 = scmp.ne.s32.totalorder %s647_s21, %s3071_s23  ;;  %p3079_p13 = scmp.lt.s32.totalorder %s647_s21, %s647_s21 }
 0x18b   : > { %p3080_p0 = scmp.lt.s32.totalorder %s3078_s30, %s3071_s23 }
 0x18c   : > { %p3074_p11 = pnand %p3072_p10, %p3647_p8 }
 0x18d   : > { %p3081_p2 = por %p3080_p0, %p3079_p13 }
 0x18e   : > { %p3075_p12 = pneg %p3074_p11 }
 0x190   : > { %p3082_p5 = pnand %p3081_p2, %p3075_p12 }
 0x192   : > { %3085 = shalt.err (!%p3082_p5)
}
 0x193   : > { %2464 = dma.hbm_to_vmem [thread:$0]  (!%p3631_p6), %s4412_s8, 16, %s647_s21, [#allocation18]  }
 0x194   : > { %s3086_s28 = scalar_lea.hbm %s4336_s10, 16 }
 0x195   : > { %p3087_p7 = scmp.ne.s32.totalorder %s4336_s10, %s3086_s28  ;;  %p3093_p1 = scmp.lt.u32.totalorder %s3086_s28, %s4336_s10 }
 0x197   : > { %p3089_p9 = pnand %p3087_p7, %p3647_p8 }
 0x199   : > { %p3090_p4 = pneg %p3089_p9 }
 0x19b   : > { %p3095_p3 = pnand %p3093_p1, %p3090_p4 }
 0x19d   : > { %3098 = shalt.err (!%p3095_p3)
}
 0x19e   : > { %s3099_s20 = scalar_lea.vmem %s671_s18, 16  ;;  %s3106_s21 = scalar_lea.vmem %s671_s18, 32 }
 0x19f   : > { %p3100_p10 = scmp.ne.s32.totalorder %s671_s18, %s3099_s20  ;;  %p3107_p13 = scmp.lt.s32.totalorder %s671_s18, %s671_s18 }
 0x1a0   : > { %p3108_p0 = scmp.lt.s32.totalorder %s3106_s21, %s3099_s20 }
 0x1a1   : > { %p3102_p11 = pnand %p3100_p10, %p3647_p8 }
 0x1a2   : > { %p3109_p2 = por %p3108_p0, %p3107_p13 }
 0x1a3   : > { %p3103_p12 = pneg %p3102_p11 }
 0x1a5   : > { %p3110_p5 = pnand %p3109_p2, %p3103_p12 }
 0x1a7   : > { %3113 = shalt.err (!%p3110_p5)
}
 0x1a8   : > { %2470 = dma.hbm_to_vmem [thread:$0]  (!%p3631_p6), %s4336_s10, 16, %s671_s18, [#allocation21]  }
 0x1a9   : > { %s3457_s2 = smov [#allocation25]   ;;  %s3458_s26 = smov [#allocation28]  }
 0x1aa   : > { %s694_s5 = sshll.u32 %s3457_s2, 4  ;;  %s716_s16 = sshll.u32 %s3458_s26, 4  ;;  %s695_s5 = int_to_ptr.vmem [resolvable:$true] %s694_s5  ;;  %s717_s16 = int_to_ptr.vmem [resolvable:$true] %s716_s16 }
 0x1ab   : > { %s3114_s3 = scalar_lea.hbm %s4338_s12, 16 }
 0x1ac   : > { %p3115_p7 = scmp.ne.s32.totalorder %s4338_s12, %s3114_s3  ;;  %p3121_p1 = scmp.lt.u32.totalorder %s3114_s3, %s4338_s12 }
 0x1ae   : > { %p3117_p9 = pnand %p3115_p7, %p3647_p8 }
 0x1b0   : > { %p3118_p4 = pneg %p3117_p9 }
 0x1b2   : > { %p3123_p3 = pnand %p3121_p1, %p3118_p4 }
 0x1b4   : > { %3126 = shalt.err (!%p3123_p3)
}
 0x1b5   : > { %s3127_s18 = scalar_lea.vmem %s695_s5, 16  ;;  %s3134_s23 = scalar_lea.vmem %s695_s5, 32 }
 0x1b6   : > { %p3128_p10 = scmp.ne.s32.totalorder %s695_s5, %s3127_s18  ;;  %p3135_p13 = scmp.lt.s32.totalorder %s695_s5, %s695_s5 }
 0x1b7   : > { %p3136_p0 = scmp.lt.s32.totalorder %s3134_s23, %s3127_s18 }
 0x1b8   : > { %p3130_p11 = pnand %p3128_p10, %p3647_p8 }
 0x1b9   : > { %p3137_p2 = por %p3136_p0, %p3135_p13 }
 0x1ba   : > { %p3131_p12 = pneg %p3130_p11 }
 0x1bc   : > { %p3138_p5 = pnand %p3137_p2, %p3131_p12 }
 0x1be   : > { %3141 = shalt.err (!%p3138_p5)
}
 0x1bf   : > { %2476 = dma.hbm_to_vmem [thread:$0]  (!%p3631_p6), %s4338_s12, 16, %s695_s5, [#allocation24]  }
 0x1c0   : > { %s3142_s4 = scalar_lea.hbm %s4340_s14, 16 }
 0x1c1   : > { %p3143_p7 = scmp.ne.s32.totalorder %s4340_s14, %s3142_s4  ;;  %p3149_p1 = scmp.lt.u32.totalorder %s3142_s4, %s4340_s14 }
 0x1c3   : > { %p3145_p9 = pnand %p3143_p7, %p3647_p8 }
 0x1c5   : > { %p3146_p4 = pneg %p3145_p9 }
 0x1c7   : > { %p3151_p3 = pnand %p3149_p1, %p3146_p4 }
 0x1c9   : > { %3154 = shalt.err (!%p3151_p3)
}
 0x1ca   : > { %s3155_s21 = scalar_lea.vmem %s717_s16, 16  ;;  %s3162_s5 = scalar_lea.vmem %s717_s16, 32 }
 0x1cb   : > { %p3156_p10 = scmp.ne.s32.totalorder %s717_s16, %s3155_s21  ;;  %p3163_p13 = scmp.lt.s32.totalorder %s717_s16, %s717_s16 }
 0x1cc   : > { %p3164_p0 = scmp.lt.s32.totalorder %s3162_s5, %s3155_s21 }
 0x1cd   : > { %p3158_p11 = pnand %p3156_p10, %p3647_p8 }
 0x1ce   : > { %p3165_p2 = por %p3164_p0, %p3163_p13 }
 0x1cf   : > { %p3159_p12 = pneg %p3158_p11 }
 0x1d1   : > { %p3166_p5 = pnand %p3165_p2, %p3159_p12 }
 0x1d3   : > { %3169 = shalt.err (!%p3166_p5)
}
 0x1d4   : > { %2482 = dma.hbm_to_vmem [thread:$0]  (!%p3631_p6), %s4340_s14, 16, %s717_s16, [#allocation27]  }
 0x1d5   : > { %s3459_s30 = smov [#allocation31]   ;;  %s3460_s26 = smov [#allocation34]  }
 0x1d6   : > { %s740_s2 = sshll.u32 %s3459_s30, 4  ;;  %s764_s28 = sshll.u32 %s3460_s26, 4  ;;  %s741_s2 = int_to_ptr.vmem [resolvable:$true] %s740_s2  ;;  %s765_s28 = int_to_ptr.vmem [resolvable:$true] %s764_s28 }
 0x1d7   : > { %s4413_s25 = sld [smem:[#allocation69_spill]] }
 0x1dd   : > { %s4414_s20 = smov %s4413_s25  ;;  %s3170_s27 = scalar_lea.hbm %s4413_s25, 16 }
 0x1de   : > { %p3171_p7 = scmp.ne.s32.totalorder %s4414_s20, %s3170_s27  ;;  %p3177_p1 = scmp.lt.u32.totalorder %s3170_s27, %s4414_s20 }
 0x1e0   : > { %p3173_p9 = pnand %p3171_p7, %p3647_p8 }
 0x1e2   : > { %p3174_p4 = pneg %p3173_p9 }
 0x1e4   : > { %p3179_p3 = pnand %p3177_p1, %p3174_p4 }
 0x1e6   : > { %3182 = shalt.err (!%p3179_p3)
}
 0x1e7   : > { %s3183_s16 = scalar_lea.vmem %s741_s2, 16  ;;  %s3190_s23 = scalar_lea.vmem %s741_s2, 32 }
 0x1e8   : > { %p3184_p10 = scmp.ne.s32.totalorder %s741_s2, %s3183_s16  ;;  %p3191_p13 = scmp.lt.s32.totalorder %s741_s2, %s741_s2 }
 0x1e9   : > { %p3192_p0 = scmp.lt.s32.totalorder %s3190_s23, %s3183_s16 }
 0x1ea   : > { %p3186_p11 = pnand %p3184_p10, %p3647_p8 }
 0x1eb   : > { %p3193_p2 = por %p3192_p0, %p3191_p13 }
 0x1ec   : > { %p3187_p12 = pneg %p3186_p11 }
 0x1ee   : > { %p3194_p5 = pnand %p3193_p2, %p3187_p12 }
 0x1f0   : > { %3197 = shalt.err (!%p3194_p5)
}
 0x1f1   : > { %2488 = dma.hbm_to_vmem [thread:$0]  (!%p3631_p6), %s4414_s20, 16, %s741_s2, [#allocation30]  }
 0x1f2   : > { %s4415_s3 = sld [smem:[#allocation70_spill]] }
 0x1f8   : > { %s4416_s21 = smov %s4415_s3  ;;  %s3198_s25 = scalar_lea.hbm %s4415_s3, 16 }
 0x1f9   : > { %p3199_p7 = scmp.ne.s32.totalorder %s4416_s21, %s3198_s25  ;;  %p3205_p1 = scmp.lt.u32.totalorder %s3198_s25, %s4416_s21 }
 0x1fb   : > { %p3201_p9 = pnand %p3199_p7, %p3647_p8 }
 0x1fd   : > { %p3202_p4 = pneg %p3201_p9 }
 0x1ff   : > { %p3207_p3 = pnand %p3205_p1, %p3202_p4 }
 0x201   : > { %3210 = shalt.err (!%p3207_p3)
}
 0x202   : > { %s3211_s23 = scalar_lea.vmem %s765_s28, 16  ;;  %s3218_s2 = scalar_lea.vmem %s765_s28, 32 }
 0x203   : > { %p3212_p10 = scmp.ne.s32.totalorder %s765_s28, %s3211_s23  ;;  %p3219_p13 = scmp.lt.s32.totalorder %s765_s28, %s765_s28 }
 0x204   : > { %p3220_p0 = scmp.lt.s32.totalorder %s3218_s2, %s3211_s23 }
 0x205   : > { %p3214_p11 = pnand %p3212_p10, %p3647_p8 }
 0x206   : > { %p3221_p2 = por %p3220_p0, %p3219_p13 }
 0x207   : > { %p3215_p12 = pneg %p3214_p11 }
 0x209   : > { %p3222_p5 = pnand %p3221_p2, %p3215_p12 }
 0x20b   : > { %3225 = shalt.err (!%p3222_p5)
}
 0x20c   : > { %2494 = dma.hbm_to_vmem [thread:$0]  (!%p3631_p6), %s4416_s21, 16, %s765_s28, [#allocation33]  }
 0x20d   : > { %s3461_s0 = smov [#allocation37]   ;;  %s4417_s27 = sld [smem:[#allocation71_spill]] }
 0x20e   : > { %s786_s4 = sshll.u32 %s3461_s0, 4  ;;  %s787_s4 = int_to_ptr.vmem [resolvable:$true] %s786_s4 }
 0x213   : > { %s4418_s5 = smov %s4417_s27  ;;  %s3226_s18 = scalar_lea.hbm %s4417_s27, 16 }
 0x214   : > { %p3227_p7 = scmp.ne.s32.totalorder %s4418_s5, %s3226_s18  ;;  %p3233_p1 = scmp.lt.u32.totalorder %s3226_s18, %s4418_s5 }
 0x216   : > { %p3229_p9 = pnand %p3227_p7, %p3647_p8 }
 0x218   : > { %p3230_p4 = pneg %p3229_p9 }
 0x21a   : > { %p3235_p3 = pnand %p3233_p1, %p3230_p4 }
 0x21c   : > { %3238 = shalt.err (!%p3235_p3)
}
 0x21d   : > { %s3239_s28 = scalar_lea.vmem %s787_s4, 16  ;;  %s3246_s30 = scalar_lea.vmem %s787_s4, 32 }
 0x21e   : > { %p3240_p10 = scmp.ne.s32.totalorder %s787_s4, %s3239_s28  ;;  %p3247_p13 = scmp.lt.s32.totalorder %s787_s4, %s787_s4 }
 0x21f   : > { %p3248_p0 = scmp.lt.s32.totalorder %s3246_s30, %s3239_s28 }
 0x220   : > { %p3242_p11 = pnand %p3240_p10, %p3647_p8 }
 0x221   : > { %p3249_p2 = por %p3248_p0, %p3247_p13 }
 0x222   : > { %p3243_p12 = pneg %p3242_p11 }
 0x224   : > { %p3250_p5 = pnand %p3249_p2, %p3243_p12 }
 0x226   : > { %3253 = shalt.err (!%p3250_p5)
}
 0x227   : > { %s4419_s0 = sld [smem:[#allocation56_spill]]  ;;  %s4420_s3 = sld [smem:[#allocation55_spill]] }
 0x228   : > { %s4421_s25 = sld [smem:[#allocation53_spill]]  ;;  %s4422_s27 = sld [smem:[#allocation52_spill]] }
 0x229   : > { %s4423_s22 = sld [smem:[#allocation51_spill]]  ;;  %s4424_s18 = sld [smem:[#allocation57_spill]] }
 0x22a   : > { %2500 = dma.hbm_to_vmem [thread:$0]  (!%p3631_p6), %s4418_s5, 16, %s787_s4, [#allocation36]  }
 0x22b   : > { %s4431_s7 = sld [smem:[#allocation59_spill]] }
 0x22d   : > { %s2155_s16 = sadd.s32 4294967294, %s4419_s0   ;;  %s59_s23 = sadd.s32 1, %s4420_s3 }
 0x22e   : > { %p61_p8 = scmp.ge.s32.totalorder %s59_s23, 2  ;;  %s66_s1 = sadd.s32 1, %s4421_s25 }
 0x22f   : > { %p73_p7 = scmp.ne.s32.totalorder %s4421_s25, %s4422_s27  ;;  %p74_p9 = scmp.eq.s32.totalorder %s4419_s0, 0 }
 0x230   : > { %s4450_s23 = smov (%p61_p8, %s59_s23), 0  ;;  %p79_p1 = scmp.ne.s32.totalorder %s4422_s27, %s4423_s22 }
 0x231   : > { %p4041_p4 = por %p74_p9, %p73_p7  ;;  %s63_s4 = ssub.s32 %s4420_s3, %s4450_s23 }
 0x232   : > { %s4426_s28 = sadd.s32 4294967295, %s4419_s0   ;;  %p64_p3 = scmp.eq.s32.totalorder %s63_s4, 0 }
 0x233   : > { %p535_p6 = scmp.eq.s32.totalorder %s4426_s28, 1  ;;  %p4427_p10 = scmp.ne.s32.totalorder %s4424_s18, 0 }
 0x234   : > { %p541_p13 = scmp.eq.s32.totalorder %s2155_s16, 1  ;;  %p2529_p2 = scmp.lt.s32.totalorder %s4419_s0, 2 }
 0x235   : > { %p4053_p11 = por %p4427_p10, %p79_p1  ;;  %p4057_p12 = por %p535_p6, %p73_p7 }
 0x236   : > { %s4062_s26 = scalar_select %p64_p3, %s4421_s25, %s66_s1  }
 0x237   : > { %s4429_s6 = scalar_select %p4057_p12, 1, 0 }
 0x238   : > { %p4064_p0 = por %p541_p13, %p79_p1  ;;  %s797_s27 = sand.u32 1, %s4421_s25  }
 0x239   : > { %s2179_s22 = sshll.u32 %s4420_s3, 7  ;;  %s2178_s4 = sshll.u32 %s797_s27, 3 }
 0x23a   : > { %s4430_s5 = scalar_select %p4064_p0, 1, 0 }
 0x23b   : > { %s4074_s8 = scalar_lea.hbm %s4431_s7, %s2179_s22  ;;  %s801_s16 = scalar_lea.vmem [#allocation5], %s2178_s4 }
 0x23c   : > { %s808_s1 = sshll.u32 %s801_s16, 4  ;;  %p4078_p5 = pnand %p2529_p2, %p4041_p4  ;;  %s4082_s1 = int_to_ptr.vmem [resolvable:$true] %s808_s1 }
 0x23d   : > { %s798_s0 = scalar_lea.sflag [#allocation6], %s797_s27  ;;  %s3254_s3 = scalar_lea.hbm %s4074_s8, 128 }
 0x23e   : > { %p3255_p8 = scmp.ne.s32.totalorder %s4074_s8, %s3254_s3  ;;  %p3256_p7 = pneg %p4078_p5 }
 0x23f   : > { %s3259_s2 = scalar_lea.hbm %s4431_s7, 256  ;;  %p3260_p4 = scmp.lt.u32.totalorder %s4074_s8, %s4431_s7 }
 0x240   : > { %p3257_p9 = pnand %p3256_p7, %p3255_p8  ;;  %p3261_p6 = scmp.lt.u32.totalorder %s3259_s2, %s3254_s3 }
 0x241   : > { %p3263_p10 = scmp.lt.u32.totalorder %s3254_s3, %s4074_s8 }
 0x242   : > { %p3258_p1 = pneg %p3257_p9  ;;  %p3262_p3 = por %p3261_p6, %p3260_p4 }
 0x244   : > { %p3264_p13 = por %p3263_p10, %p3262_p3 }
 0x246   : > { %p3265_p2 = pnand %p3264_p13, %p3258_p1 }
 0x248   : > { %3268 = shalt.err (!%p3265_p2)
}
 0x249   : > { %s3269_s27 = scalar_lea.vmem %s4082_s1, 128  ;;  %s3462_s28 = smov [#allocation5]  }
 0x24a   : > { %p3270_p8 = scmp.ne.s32.totalorder %s4082_s1, %s3269_s27  ;;  %s3274_s16 = sshll.u32 %s3462_s28, 4  ;;  %s3275_s16 = int_to_ptr.vmem [resolvable:$false] %s3274_s16 }
 0x24b   : > { %s3276_s25 = scalar_lea.vmem %s3275_s16, 256  ;;  %p3277_p12 = scmp.lt.s32.totalorder %s4082_s1, %s3275_s16 }
 0x24c   : > { %p3272_p9 = pnand %p3270_p8, %p3256_p7  ;;  %p3278_p4 = scmp.lt.s32.totalorder %s3276_s25, %s3269_s27 }
 0x24e   : > { %p3273_p0 = pneg %p3272_p9  ;;  %p3279_p6 = por %p3278_p4, %p3277_p12 }
 0x250   : > { %p3280_p3 = pnand %p3279_p6, %p3273_p0 }
 0x252   : > { %3283 = shalt.err (!%p3280_p3)
}
 0x253   : > { %2504 = dma.hbm_to_vmem [thread:$0]  (!%p4078_p5), %s4074_s8, 128, %s4082_s1, %s798_s0  }
 0x254   : > { %s4433_s3 = sld [smem:[#allocation58_spill]] }
 0x25a   : > { %p4434_p1 = scmp.ne.s32.totalorder %s4433_s3, 0 }
 0x25b   : > { %s4435_s22 = sld [smem:[#allocation52_spill]] (!%p4434_p1) }
 0x25c   : > { %817 = sbr.rel (%p4434_p1) target bundleno = 3967 (0xf7f), region = 104 }
 0x261   : > { %s4112_s2 = sand.u32 (!%p4434_p1), 1, %s4435_s22  }
 0x262   : > { %s2181_s4 = sshll.u32 (!%p4434_p1), %s4112_s2, 3  ;;  %s820_s18 = scalar_lea.sflag (!%p4434_p1), [#allocation6], %s4112_s2 }
 0x263   : > { %s4118_s27 = scalar_lea.vmem [#allocation5], %s2181_s4 }
 0x264   : > { %3353 = dma.done.wait (%p4053_p11), %s820_s18, 128  }
 0x265   : > { %3355 = vsyncadd (%p4053_p11), %s820_s18, 4294967168  ;;  %s4436_s8 = sld [smem:[#allocation57_spill]] }
 0x26b   : > { %p4437_p12 = scmp.ne.s32.totalorder %s4436_s8, 0 }
 0x26d   : > { %3357 = dma.done.wait (%p4437_p12), [#allocation9], 256  }
 0x26e   : > { %3359 = vsyncadd (%p4437_p12), [#allocation9], 4294967040 }
 0x26f   : > { %3361 = dma.done.wait (%p4437_p12), [#allocation12], 256  }
 0x270   : > { %3363 = vsyncadd (%p4437_p12), [#allocation12], 4294967040 }
 0x271   : > { %3365 = dma.done.wait (%p4437_p12), [#allocation15], 272  }
 0x272   : > { %3367 = vsyncadd (%p4437_p12), [#allocation15], 4294967024 }
 0x273   : > { %3369 = dma.done.wait (%p4437_p12), [#allocation18], 272  }
 0x274   : > { %3371 = vsyncadd (%p4437_p12), [#allocation18], 4294967024 }
 0x275   : > { %3373 = dma.done.wait (%p4437_p12), [#allocation21], 272  }
 0x276   : > { %3375 = vsyncadd (%p4437_p12), [#allocation21], 4294967024 }
 0x277   : > { %3377 = dma.done.wait (%p4437_p12), [#allocation24], 272  }
 0x278   : > { %3379 = vsyncadd (%p4437_p12), [#allocation24], 4294967024 }
 0x279   : > { %3381 = dma.done.wait (%p4437_p12), [#allocation27], 32  }
 0x27a   : > { %3383 = vsyncadd (%p4437_p12), [#allocation27], 4294967264 }
 0x27b   : > { %3385 = dma.done.wait (%p4437_p12), [#allocation30], 272  }
 0x27c   : > { %3387 = vsyncadd (%p4437_p12), [#allocation30], 4294967024 }
 0x27d   : > { %3389 = dma.done.wait (%p4437_p12), [#allocation33], 528  }
 0x27e   : > { %3391 = vsyncadd (%p4437_p12), [#allocation33], 4294966768 }
 0x27f   : > { %3393 = dma.done.wait (%p4437_p12), [#allocation36], 32  }
 0x280   : > { %3395 = vsyncadd (%p4437_p12), [#allocation36], 4294967264  ;;  %v3463_v0 = vmov 0.0   ;;  %vm3464_vm0 = vmmov 0   ;;  %v2662_v1 = vld [vmem:[#allocation17] sm:$0xff]   ;;  %v2663_v2 = vld [vmem:[#allocation17 + $0x8] sm:$0xff]  }
 0x281   : > { %2280 = vmatprep.subr.bf16.mxu0 %v3463_v0  ;;  %2284 = vmatprep.mubr.msk.bf16.mxu0 %vm3464_vm0, %v3463_v0  ;;  %v4171_v3 = vld [vmem:[%s4118_s27] sm:$0xff]  ;;  %v4174_v4 = vld [vmem:[#allocation10] sm:$0xff]  ;;  %v2664_v6 = vld [vmem:[#allocation14] sm:$0xff]   ;;  %s3465_s9 = smov 8   ;;  %vm992_vm1 = vcmask 261120   ;;  %s3466_s30 = smov 120  }
 0x282   : > { %2288 = vmatprep.subr.bf16.mxu1 %v3463_v0  ;;  %2292 = vmatprep.mubr.msk.bf16.mxu1 %vm3464_vm0, %v3463_v0  ;;  %v968_v5 = vpack.c.bf16 %v4171_v3, %v4171_v3  ;;  %v4180_v7 = vld [vmem:[#allocation8] sm:$0xff]  ;;  %v2665_v8 = vld [vmem:[#allocation14 + $0x8] sm:$0xff]   ;;  %v2211_v16 = vld [vmem:[#allocation16] ss:$0 sm:$0xff]  ;;  %vm1143_vm2 = vcmask 64512   ;;  %vm1252_vm3 = vcmask 130048  }
 0x283   : > { %2281 = vmatpush3.bf16.msra.mxu0 %v2662_v1  ;;  %1228 = vrot.lane.b32.xlu0 %v4174_v4, %s3465_s9  ;;  %v2203_v9 = vld [vmem:[#allocation19] ss:$0 sm:$0xff]  ;;  %v2666_v15 = vld [vmem:[#allocation20] sm:$0xff]   ;;  %v2667_v21 = vld [vmem:[#allocation20 + $0x8] sm:$0xff]   ;;  %vm1100_vm4 = vcmask 257024   ;;  %s4212_s1 = scalar_lea.vmem [#allocation38], %s2181_s4 }
 0x284   : > { %2282 = vmatprep.subr.bf16.mxu0 %v3463_v0  ;;  %2289 = vmatpush3.bf16.msra.mxu1 %v2666_v15  ;;  %v1134_v28 = vld [vmem:[#allocation11] sm:$0xff]  ;;  %v1135_v29 = vld [vmem:[#allocation13] sm:$0xff]  ;;  %s3428_s0 = smov 0  }
 0x285   : > { %2290 = vmatprep.subr.bf16.mxu1 %v3463_v0  ;;  %v2207_v47 = vld [vmem:[#allocation22] ss:$0 sm:$0xff] }
 0x287   : > { %2283 = vmatpush3.bf16.msra.mxu0 %v2663_v2  ;;  %1238 = vrot.lane.b32.xlu0 %v4180_v7, %s3465_s9 }
 0x288   : > { %2296 = vmatprep.subr.bf16.mxu0 %v3463_v0  ;;  %2291 = vmatpush3.bf16.msra.mxu1 %v2667_v21 }
 0x289   : > { %2304 = vmatprep.subr.bf16.mxu1 %v3463_v0 }
 0x28a   : > { %2285 = vmatmul.mubr.msk.bf16.vlgmr.msra.gmra.mrb[0].mxu0 %vm992_vm1, %v968_v5 }
 0x28b   : > { %2297 = vmatpush3.bf16.msra.mxu0 %v2664_v6  ;;  %2300 = vmatprep.mubr.msk.bf16.mxu0 %vm3464_vm0, %v3463_v0 }
 0x28c   : > { %2298 = vmatprep.subr.bf16.mxu0 %v3463_v0  ;;  %2293 = vmatmul.mubr.msk.bf16.vlgmr.msra.gmra.mrb[0].mxu1 %vm992_vm1, %v968_v5 }
 0x28d   : > { %2306 = vmatprep.mubr.msk.bf16.mxu1 %vm3464_vm0, %v3463_v0 }
 0x28f   : > { %2299 = vmatpush3.bf16.msra.mxu0 %v2665_v8 }
 0x292   : > { %2301 = vmatmul.mubr.msk.bf16.vlgmr.msra.gmra.mrb[4].mxu0 %vm992_vm1, %v968_v5 }
 0x2f5   : > { %v1229_v18 = vpop.permute.xlu0 %1228 }
 0x2f9   : > { %v1239_v26 = vpop.permute.xlu0 %1238 }
 0x35d   : > { %v1030_v10 = vpop.f32.mrb[0].mxu0 }
 0x35e   : > { %v1031_v11 = vadd.f32 %v2203_v9, %v1030_v10  ;;  %v2286_v12 = vpop.f32.mrb[1].mxu0 }
 0x35f   : > { %v1033_v13 = vpop.f32.mrb[2].mxu0  ;;  %v1093_v48 = vpop.f32.mrb[0].mxu1 }
 0x360   : > { %1102 = vxpose.xlu0.b32.start.end [1/1] (short) (narrow) %v1031_v11, 32  ;;  %v2287_v14 = vpop.f32.mrb[3].mxu0  ;;  %v1094_v49 = vadd.f32 %v2207_v47, %v1093_v48  ;;  %v2294_v50 = vpop.f32.mrb[1].mxu1 }
 0x361   : > { %v1096_v51 = vpop.f32.mrb[2].mxu1 }
 0x362   : > { %v1099_v52 = vpack.c.bf16 %v1094_v49, %v1094_v49  ;;  %v2295_v53 = vpop.f32.mrb[3].mxu1 }
 0x364   : > { %1101 = vst.msk [vmem:[#allocation3] sm:$0xf] %vm1100_vm4, %v1099_v52 }
 0x365   : > { %v1218_v17 = vpop.f32.mrb[4].mxu0 }
 0x366   : > { %v4191_v19 = vadd.f32 %v2211_v16, %v1218_v17  ;;  %v2302_v20 = vpop.f32.mrb[5].mxu0 }
 0x367   : > { %v1221_v22 = vpop.f32.mrb[6].mxu0 }
 0x368   : > { %v1231_v23 = vmul.f32 %v1229_v18, %v4191_v19  ;;  %v2303_v24 = vpop.f32.mrb[7].mxu0  ;;  %v1242_v25 = vmul.f32 %v4174_v4, %v4191_v19  ;;  %v1241_v40 = vmul.f32 %v1239_v26, %v4191_v19  ;;  %v1226_v41 = vmul.f32 %v4180_v7, %v4191_v19 }
 0x36a   : > { %1233 = vrot.lane.b32.xlu1 %v1231_v23, %s3466_s30 }
 0x36e   : > { %1244 = vrot.lane.b32.xlu1 %v1242_v25, %s3465_s9 }
 0x3dc   : > { %v1234_v30 = vpop.permute.xlu1 %1233 }
 0x3dd   : > { %v1236_v43 = vsub.f32 %v1226_v41, %v1234_v30 }
 0x3e0   : > { %v1118_v27 = vpop.trf.xlu0  ;;  %v1245_v39 = vpop.permute.xlu1 %1244 }
 0x3e1   : > { %v1136_v32 = vmul.f32 %v1134_v28, %v1118_v27  ;;  %v1140_v33 = vmul.f32 %v1135_v29, %v1118_v27  ;;  %v1247_v42 = vadd.f32 %v1245_v39, %v1241_v40 }
 0x3e3   : > { %v1249_v44 = vsel %vm1143_vm2, %v1236_v43, %v1247_v42 }
 0x3e4   : > { %v1119_v31 = vpop.trf.xlu0  ;;  %v1250_v46 = vpack.c.bf16 %v1249_v44, %v1249_v44 }
 0x3e5   : > { %v1137_v34 = vmul.f32 %v1135_v29, %v1119_v31  ;;  %v1139_v35 = vmul.f32 %v1134_v28, %v1119_v31 }
 0x3e7   : > { %v1138_v36 = vsub.f32 %v1136_v32, %v1137_v34  ;;  %v1141_v37 = vadd.f32 %v1140_v33, %v1139_v35 }
 0x3e8   : > { %v1120_v54 = vpop.trf.xlu0 }
 0x3e9   : > { %v1142_v38 = vpack.c.bf16 %v1141_v37, %v1138_v36  ;;  %v1145_v55 = vmul.f32 %v1134_v28, %v1120_v54  ;;  %v1149_v56 = vmul.f32 %v1135_v29, %v1120_v54 }
 0x3eb   : > { %1144 = vst.msk [vmem:[#allocation2] sm:$0xff] %vm1143_vm2, %v1142_v38 }
 0x3ec   : > { %v1121_v57 = vpop.trf.xlu0 }
 0x3ed   : > { %v1146_v58 = vmul.f32 %v1135_v29, %v1121_v57  ;;  %v1148_v59 = vmul.f32 %v1134_v28, %v1121_v57 }
 0x3ef   : > { %v1147_v60 = vsub.f32 %v1145_v55, %v1146_v58  ;;  %v1150_v61 = vadd.f32 %v1149_v56, %v1148_v59 }
 0x3f1   : > { %v1151_v62 = vpack.c.bf16 %v1150_v61, %v1147_v60 }
 0x3f2   : > { %v1251_v45 = vld [vmem:[#allocation2] sm:$0xff] }
 0x3f3   : > { %2305 = vmatpush3.bf16.msra.mxu1 %v1251_v45  ;;  %1152 = vst.msk [vmem:[#allocation2 + $0x8] sm:$0xff] %vm1143_vm2, %v1151_v62 }
 0x3f6   : > { %2307 = vmatmul.mubr.msk.bf16.vlgmr.msra.gmra.mrb[4].mxu1 %vm1252_vm3, %v1250_v46 }
 0x4c9   : > { %v1290_v63 = vpop.f32.mrb[4].mxu1 }
 0x4ca   : > { %v2308_v1 = vpop.f32.mrb[5].mxu1  ;;  %v1296_v2 = vsel %vm1143_vm2, %v1290_v63, -inf }
 0x4cb   : > { %1297 = vmax.xlane.f32.xlu1 %v1296_v2  ;;  %v1293_v5 = vpop.f32.mrb[6].mxu1 }
 0x4cc   : > { %v2309_v6 = vpop.f32.mrb[7].mxu1 }
 0x558   : > { %v1298_v8 = vpop.xlane.xlu1 %1297 }
 0x559   : > { %v2216_v9 = vadd.f32 -1.0, %v1298_v8  }
 0x55b   : > { %v3424_v10 = vmov %v2216_v9  }
 0x55c LB: >> { %vm1307_vm5 = vcmp.gt.f32.partialorder %v1290_v63, %v3426_v10  ;;  %v3467_v11 = vmov 0.0   ;;  %s1305_s0 = sadd.s32 1, %s3430_s0   ;;  %s3430_s0 = sphi %s3428_s0, %s1305_s0   ;;  %v3426_v10 = vphi %v3424_v10, %v3425_v10  }
 0x55d   : >> { %v2217_v12 = vsel %vm1307_vm5, 1.0, %v3467_v11  ;;  %p1302_p11 = scmp.ge.s32.totalorder %s1305_s0, 10  }
 0x55e   : >> { %v1314_v13 = vsel %vm1143_vm2, %v2217_v12, 0.0  ;;  %v1310_v14 = vmul.f32 %v2217_v12, %v1290_v63  ;;  %2316 = vmatprep.subr.bf16.mxu1 (%p1302_p11), %v3463_v0  ;;  %2318 = vmatprep.mubr.msk.bf16.mxu1 (%p1302_p11), %vm3464_vm0, %v3463_v0  ;;  %s3468_s28 = smov (%p1302_p11), 24   ;;  %s3469_s16 = smov (%p1302_p11), 16   ;;  %v1410_v27 = vld [vmem:[#allocation2 + $0x8] sm:$0xff] (%p1302_p11)  ;;  %v1323_v29 = vld [vmem:[#allocation3] sm:$0xf] (%p1302_p11) }
 0x55f   : >> { %1315 = vadd.xlane.f32.xlu0 %v1314_v13  ;;  %1374 = vrot.lane.b32.xlu1 (%p1302_p11), %v4180_v7, %s3469_s16  ;;  %vm1327_vm6 = vcmask (%p1302_p11), 1043456   ;;  %s3470_s25 = smov (%p1302_p11), 112   ;;  %vm1372_vm7 = vcmask (%p1302_p11), 125952   ;;  %s3436_s3 = smov (%p1302_p11), 0  }
 0x560   : >> { %v1311_v15 = vsel %vm1143_vm2, %v1310_v14, 0.0  ;;  %2310 = vmatprep.subr.bf16.mxu0 (%p1302_p11), %v3463_v0  ;;  %2312 = vmatprep.mubr.msk.bf16.mxu0 (%p1302_p11), %vm3464_vm0, %v3463_v0 }
 0x561   : > { %2317 = vmatpush3.bf16.msra.mxu1 (%p1302_p11), %v1410_v27 }
 0x563   : >> { %1312 = vadd.xlane.f32.xlu0 %v1311_v15  ;;  %1387 = vrot.lane.b32.xlu1 (%p1302_p11), %v4180_v7, %s3468_s28  ;;  %v1329_v7 = vsel (%p1302_p11), %vm1327_vm6, %v1323_v29, 0 }
 0x564   : > { %2311 = vmatpush3.bf16.msra.mxu0 (%p1302_p11), %v1329_v7 }
 0x579   : > { %1378 = vrot.lane.b32.xlu0 (%p1302_p11), %v4174_v4, %s3468_s28 }
 0x57d   : > { %1391 = vrot.lane.b32.xlu0 (%p1302_p11), %v4174_v4, %s3469_s16 }
 0x5d1   : > { %v1375_v26 = vpop.permute.xlu1 (%p1302_p11), %1374 }
 0x5d2   : > { %v1377_v31 = vmul.f32 (%p1302_p11), %v1375_v26, %v4191_v19 }
 0x5d5   : > { %v1388_v28 = vpop.permute.xlu1 (%p1302_p11), %1387 }
 0x5d6   : > { %v1390_v32 = vmul.f32 (%p1302_p11), %v1388_v28, %v4191_v19 }
 0x5ec   : >> { %v1316_v16 = vpop.xlane.xlu0 %1315 }
 0x5ed   : >> { %2668 = vrcp.f32 %v1316_v16 }
 0x5f0   : >> { %v1313_v17 = vpop.xlane.xlu0 %1312 }
 0x5f1   : >> { %v2218_v18 = vadd.f32 -1.0, %v1313_v17 }
 0x5f4   : > { %1304 = sbr.rel (!%p1302_p11) target bundleno = 1372 (0x55c), region = 250  ;;  %v1379_v22 = vpop.permute.xlu0 (%p1302_p11), %1378 }
 0x5f5   : > { %v1381_v23 = vmul.f32 (%p1302_p11), %v1379_v22, %v4191_v19 }
 0x5f7   : >> { %v2669_v20 = vpop.eup %2668  ;;  %1383 = vrot.lane.b32.xlu0 (%p1302_p11), %v1381_v23, %s3466_s30 }
 0x5f8   : >> { %v1319_v21 = vmul.f32 %v2669_v20, %v2218_v18   ;;  %v1392_v24 = vpop.permute.xlu0 (%p1302_p11), %1391 }
 0x5f9   : > { %v1394_v25 = vmul.f32 (%p1302_p11), %v1392_v24, %v4191_v19 }
 0x5fa   : >> { %v3425_v10 = vmov %v1319_v21   ;;  %v1320_v30 = vsub.f32 (%p1302_p11), %v1290_v63, %v1319_v21 }
 0x5fb   : > { %1396 = vrot.lane.b32.xlu1 %v1394_v25, %s3465_s9 }
 0x5fc   : > { %v1321_v33 = vmax.f32 %v1320_v30, 0.0 }
 0x5fe   : > { %v1322_v37 = vpack.c.bf16 %v1321_v33, %v1321_v33 }
 0x600   : > { %2313 = vmatmul.mubr.msk.bf16.vlgmr.msra.gmra.mrb[8].mxu0 %vm1143_vm2, %v1322_v37 }
 0x669   : > { %v1384_v4 = vpop.permute.xlu0 %1383 }
 0x66a   : > { %v1386_v35 = vsub.f32 %v1377_v31, %v1384_v4 }
 0x66d   : > { %v1397_v34 = vpop.permute.xlu1 %1396 }
 0x66e   : > { %v1399_v36 = vadd.f32 %v1397_v34, %v1390_v32 }
 0x670   : > { %v2670_v38 = vpack.i.bf16 %v1399_v36, %v1386_v35 }
 0x672   : > { %2671 = vrot.lane.b32.xlu0 %v2670_v38, %s3470_s25 }
 0x6d3   : > { %v1365_v19 = vpop.f32.mrb[8].mxu0 }
 0x6d4   : > { %v1371_v44 = vpack.c.bf16 %v1365_v19, %v1365_v19  ;;  %v2314_v45 = vpop.f32.mrb[9].mxu0 }
 0x6d5   : > { %v1368_v46 = vpop.f32.mrb[10].mxu0 }
 0x6d6   : > { %1373 = vst.msk [vmem:[#allocation4] sm:$0xf] %vm1372_vm7, %v1371_v44  ;;  %v2315_v47 = vpop.f32.mrb[11].mxu0 }
 0x6e4   : > { %v2672_v39 = vpop.permute.xlu0 %2671 }
 0x6e5   : > { %v2674_v40 = vunpack.i.h.bf16 %v2672_v39  ;;  %v2673_v41 = vunpack.i.l.bf16 %v2672_v39 }
 0x6e7   : > { %v1408_v42 = vsel %vm1143_vm2, %v2673_v41, %v2674_v40 }
 0x6e8   : > { %v1409_v43 = vpack.c.bf16 %v1408_v42, %v1408_v42 }
 0x6ea   : > { %2319 = vmatmul.mubr.msk.bf16.vlgmr.msra.gmra.mrb[8].mxu1 %vm1252_vm3, %v1409_v43 }
 0x7bd   : > { %v1448_v48 = vpop.f32.mrb[8].mxu1 }
 0x7be   : > { %v2320_v49 = vpop.f32.mrb[9].mxu1  ;;  %v1454_v50 = vsel %vm1143_vm2, %v1448_v48, -inf }
 0x7bf   : > { %1455 = vmax.xlane.f32.xlu1 %v1454_v50  ;;  %v1451_v51 = vpop.f32.mrb[10].mxu1 }
 0x7c0   : > { %v2321_v52 = vpop.f32.mrb[11].mxu1 }
 0x84c   : > { %v1456_v53 = vpop.xlane.xlu1 %1455 }
 0x84d   : > { %v2221_v54 = vadd.f32 -1.0, %v1456_v53  }
 0x84f   : > { %v3432_v55 = vmov %v2221_v54  }
 0x850 LB: >> { %vm1465_vm8 = vcmp.gt.f32.partialorder %v1448_v48, %v3434_v55  ;;  %v3471_v56 = vmov 0.0   ;;  %s1463_s3 = sadd.s32 1, %s3438_s3   ;;  %s3438_s3 = sphi %s3436_s3, %s1463_s3   ;;  %v3434_v55 = vphi %v3432_v55, %v3433_v55  }
 0x851   : >> { %v2222_v57 = vsel %vm1465_vm8, 1.0, %v3471_v56  ;;  %p1460_p0 = scmp.ge.s32.totalorder %s1463_s3, 10  }
 0x852   : >> { %v1472_v58 = vsel %vm1143_vm2, %v2222_v57, 0.0  ;;  %v1468_v59 = vmul.f32 %v2222_v57, %v1448_v48  ;;  %v2677_v5 = vld [vmem:[#allocation3] ss:$0 sps:$4 sm:$0xff] (%p1460_p0)   ;;  %2322 = vmatprep.subr.bf16.mxu0 (%p1460_p0), %v3463_v0  ;;  %2324 = vmatprep.mubr.msk.bf16.mxu0 (%p1460_p0), %vm3464_vm0, %v3463_v0  ;;  %v2678_v12 = vld [vmem:[#allocation23] sm:$0xff] (%p1460_p0)   ;;  %v2679_v13 = vld [vmem:[#allocation23 + $0x8] sm:$0xff] (%p1460_p0)   ;;  %vm1540_vm9 = vcmask (%p1460_p0), 257152  }
 0x853   : >> { %1473 = vadd.xlane.f32.xlu0 %v1472_v58  ;;  %2328 = vmatprep.subr.bf16.mxu1 (%p1460_p0), %v3463_v0  ;;  %v2227_v22 = vld [vmem:[#allocation25] ss:$0 sm:$0xff] (%p1460_p0)  ;;  %v2680_v33 = vld [vmem:[#allocation29] sm:$0xff] (%p1460_p0)   ;;  %v2681_v34 = vld [vmem:[#allocation29 + $0x8] sm:$0xff] (%p1460_p0)   ;;  %vm1773_vm11 = vcmask (%p1460_p0), 523264   ;;  %s4438_s22 = sld [smem:[#allocation54_spill]] (%p1460_p0) }
 0x854   : >> { %v1469_v60 = vsel %vm1143_vm2, %v1468_v59, 0.0  ;;  %2332 = vmatprep.mubr.msk.bf16.mxu1 (%p1460_p0), %vm3464_vm0, %v3463_v0  ;;  %2329 = vmatpush3.bf16.msra.mxu1 (%p1460_p0), %v2678_v12  ;;  %v2231_v38 = vld [vmem:[#allocation26] ss:$0 sm:$0xff] (%p1460_p0)  ;;  %v2232_v40 = vld [vmem:[#allocation28] ss:$0 sm:$0xff] (%p1460_p0)  ;;  %v2682_v19 = vld [vmem:[#allocation32] sm:$0xff] (%p1460_p0)  }
 0x855   : > { %2330 = vmatprep.subr.bf16.mxu1 (%p1460_p0), %v3463_v0  ;;  %v2683_v44 = vld [vmem:[#allocation32 + $0x8] sm:$0xff] (%p1460_p0)   ;;  %v2684_v45 = vld [vmem:[#allocation32 + $0x10] sm:$0xff] (%p1460_p0)   ;;  %v2685_v46 = vld [vmem:[#allocation32 + $0x18] sm:$0xff] (%p1460_p0)   ;;  %s1863_s18 = sshll.u32 (%p1460_p0), %s4212_s1, 4  ;;  %s4439_s9 = sld [smem:[#allocation72_spill]] (%p1460_p0)  ;;  %s4277_s18 = int_to_ptr.vmem [resolvable:$true] %s1863_s18 }
 0x856   : > { %v2233_v47 = vld [vmem:[#allocation31] ss:$0 sm:$0xff] (%p1460_p0)  ;;  %s1849_s0 = scalar_lea.sflag (%p1460_p0), [#allocation7], %s4112_s2  ;;  %s3284_s28 = scalar_lea.vmem (%p1460_p0), %s4277_s18, 128 }
 0x857   : >> { %1470 = vadd.xlane.f32.xlu0 %v1469_v60  ;;  %p3285_p5 = scmp.ne.s32.totalorder (%p1460_p0), %s4277_s18, %s3284_s28  ;;  %p4440_p7 = scmp.ne.s32.totalorder (%p1460_p0), %s4429_s6, 0 }
 0x858   : > { %2331 = vmatpush3.bf16.msra.mxu1 (%p1460_p0), %v2679_v13 }
 0x859   : > { %2344 = vmatprep.subr.bf16.mxu1 (%p1460_p0), %v3463_v0  ;;  %s2248_s4 = sshll.u32 (%p1460_p0), %s4438_s22, 7  ;;  %p3286_p10 = pnand (%p1460_p0), %p3285_p5, %p4440_p7 }
 0x85b   : > { %s4275_s30 = scalar_lea.hbm (%p1460_p0), %s4439_s9, %s2248_s4  ;;  %p3287_p13 = pneg (%p1460_p0), %p3286_p10 }
 0x86d   : > { %1485 = vrot.lane.b32.xlu0 (%p1460_p0), %v2677_v5, %s3470_s25 }
 0x8e0   : >> { %v1474_v61 = vpop.xlane.xlu0 %1473 }
 0x8e1   : >> { %2675 = vrcp.f32 %v1474_v61 }
 0x8e4   : >> { %v1471_v62 = vpop.xlane.xlu0 %1470 }
 0x8e5   : >> { %v2223_v63 = vadd.f32 -1.0, %v1471_v62 }
 0x8e8   : > { %1462 = sbr.rel (!%p1460_p0) target bundleno = 2128 (0x850), region = 261  ;;  %v1486_v9 = vpop.permute.xlu0 (%p1460_p0), %1485 }
 0x8e9   : > { %v1491_v10 = vsel (%p1460_p0), %vm1327_vm6, %v1486_v9, 0 }
 0x8ea   : > { %2323 = vmatpush3.bf16.msra.mxu0 (%p1460_p0), %v1491_v10 }
 0x8eb   : >> { %v2676_v1 = vpop.eup %2675  ;;  %2336 = vmatprep.subr.bf16.mxu0 (%p1460_p0), %v3463_v0 }
 0x8ec   : >> { %v1477_v2 = vmul.f32 %v2676_v1, %v2223_v63  }
 0x8ee   : >> { %v3433_v55 = vmov %v1477_v2   ;;  %v1478_v6 = vsub.f32 (%p1460_p0), %v1448_v48, %v1477_v2 }
 0x8f0   : > { %v1479_v8 = vmax.f32 %v1478_v6, 0.0 }
 0x8f2   : > { %v1480_v11 = vpack.c.bf16 %v1479_v8, %v1479_v8 }
 0x8f4   : > { %2325 = vmatmul.mubr.msk.bf16.vlgmr.msra.gmra.mrb[12].mxu0 %vm1143_vm2, %v1480_v11 }
 0x8f5   : > { %2340 = vmatprep.mubr.msk.bf16.mxu0 %vm3464_vm0, %v3463_v0  ;;  %2337 = vmatpush3.bf16.msra.mxu0 %v2680_v33 }
 0x8f6   : > { %2338 = vmatprep.subr.bf16.mxu0 %v3463_v0 }
 0x8f9   : > { %2339 = vmatpush3.bf16.msra.mxu0 %v2681_v34  ;;  %v2245_v34 = vld [vmem:[#allocation35] ss:$0 sm:$0xff] }
 0x9c7   : > { %v1527_v14 = vpop.f32.mrb[12].mxu0 }
 0x9c8   : > { %v2251_v15 = vpack.c.bf16 %v1527_v14, %v1527_v14  ;;  %v2326_v16 = vpop.f32.mrb[13].mxu0 }
 0x9c9   : > { %v1530_v17 = vpop.f32.mrb[14].mxu0 }
 0x9ca   : > { %1537 = vrot.lane.b32.xlu0 %v2251_v15, %s3469_s16  ;;  %v2327_v18 = vpop.f32.mrb[15].mxu0  ;;  %s3472_s16 = smov [#allocation38]  }
 0x9cb   : > { %v2239_v18 = vld [vmem:[#allocation34] ss:$0 sm:$0xff]  ;;  %s3288_s25 = sshll.u32 %s3472_s16, 4  ;;  %s3289_s25 = int_to_ptr.vmem [resolvable:$false] %s3288_s25 }
 0x9cc   : > { %s3290_s3 = scalar_lea.vmem %s3289_s25, 256  ;;  %p3291_p2 = scmp.lt.s32.totalorder %s4277_s18, %s3289_s25 }
 0x9cd   : > { %p3292_p8 = scmp.lt.s32.totalorder %s3290_s3, %s3284_s28 }
 0x9cf   : > { %p3293_p9 = por %p3292_p8, %p3291_p2 }
 0x9d1   : > { %p3294_p4 = pnand %p3293_p9, %p3287_p13 }
 0xa3c   : > { %v1538_v20 = vpop.permute.xlu0 %1537 }
 0xa3d   : > { %1541 = vst.msk [vmem:[#allocation4] sm:$0xf] %vm1540_vm9, %v1538_v20 }
 0xa44   : > { %v1542_v21 = vld [vmem:[#allocation4] sm:$0xf] }
 0xa45   : > { %2333 = vmatmul.mubr.msk.bf16.vlgmr.msra.gmra.mrb[12].mxu1 %vm992_vm1, %v1542_v21 }
 0xa46   : > { %2352 = vmatprep.mubr.msk.bf16.mxu1 %vm3464_vm0, %v3463_v0  ;;  %2345 = vmatpush3.bf16.msra.mxu1 %v2682_v19 }
 0xa47   : > { %2346 = vmatprep.subr.bf16.mxu1 %v3463_v0 }
 0xa4a   : > { %2347 = vmatpush3.bf16.msra.mxu1 %v2683_v44 }
 0xa4b   : > { %2348 = vmatprep.subr.bf16.mxu1 %v3463_v0 }
 0xa4e   : > { %2349 = vmatpush3.bf16.msra.mxu1 %v2684_v45 }
 0xa4f   : > { %2350 = vmatprep.subr.bf16.mxu1 %v3463_v0 }
 0xa52   : > { %2351 = vmatpush3.bf16.msra.mxu1 %v2685_v46 }
 0xb18   : > { %v1603_v23 = vpop.f32.mrb[12].mxu1 }
 0xb19   : > { %v1604_v24 = vadd.f32 %v2227_v22, %v1603_v23  ;;  %v2334_v25 = vpop.f32.mrb[13].mxu1 }
 0xb1a   : > { %v1606_v26 = vpop.f32.mrb[14].mxu1 }
 0xb1b   : > { %v1609_v27 = vadd.f32 %v1604_v24, %v4171_v3  ;;  %v2335_v28 = vpop.f32.mrb[15].mxu1 }
 0xb1d   : > { %v1612_v29 = vsel %vm992_vm1, %v1609_v27, 0.0 }
 0xb1e   : > { %1613 = vadd.xlane.f32.xlu1 %v1612_v29 }
 0xbab   : > { %v1614_v30 = vpop.xlane.xlu1 %1613 }
 0xbac   : > { %v1616_v4 = vmul.f32 0.03125, %v1614_v30 }
 0xbae   : > { %v1617_v7 = vsub.f32 %v1609_v27, %v1616_v4 }
 0xbb0   : > { %v1618_v31 = vmul.f32 %v1617_v7, %v1617_v7 }
 0xbb2   : > { %v1619_v32 = vsel %vm992_vm1, %v1618_v31, 0.0 }
 0xbb3   : > { %1620 = vadd.xlane.f32.xlu1 %v1619_v32 }
 0xc40   : > { %v1621_v35 = vpop.xlane.xlu1 %1620 }
 0xc41   : > { %v1622_v36 = vmul.f32 0.03125, %v1621_v35 }
 0xc43   : > { %v1623_v3 = vadd.f32 1e-12, %v1622_v36  ;;  %v2246_v36 = vld [vmem:[#allocation37] ss:$0 sm:$0xff] }
 0xc45   : > { %2686 = vrsqrt.f32 %v1623_v3 }
 0xc4f   : > { %v2687_v37 = vpop.eup %2686 }
 0xc50   : > { %v1625_v39 = vmul.f32 %v2687_v37, %v1617_v7 }
 0xc52   : > { %v1632_v41 = vmul.f32 %v2231_v38, %v1625_v39 }
 0xc54   : > { %v1639_v42 = vadd.f32 %v2232_v40, %v1632_v41 }
 0xc56   : > { %v1640_v43 = vpack.c.bf16 %v1639_v42, %v1639_v42 }
 0xc58   : > { %2341 = vmatmul.mubr.msk.bf16.vlgmr.msra.gmra.mrb[16].mxu0 %vm992_vm1, %v1640_v43 }
 0xd2b   : > { %v1701_v48 = vpop.f32.mrb[16].mxu0 }
 0xd2c   : > { %v1702_v49 = vadd.f32 %v2233_v47, %v1701_v48  ;;  %v2342_v50 = vpop.f32.mrb[17].mxu0 }
 0xd2d   : > { %v1704_v51 = vpop.f32.mrb[18].mxu0 }
 0xd2e   : > { %v1707_v52 = vmul.f32 0.70710677, %v1702_v49  ;;  %v2343_v53 = vpop.f32.mrb[19].mxu0  ;;  %v1730_v14 = vmul.f32 0.5, %v1702_v49 }
 0xd30   : > { %v1708_v54 = vand.u32 2147483647, %v1707_v52  ;;  %vm1727_vm10 = vcmp.ge.f32.partialorder %v1707_v52, 0.0 }
 0xd32   : > { %v1709_v55 = vmul.f32 0.3275911, %v1708_v54  ;;  %v1721_v57 = vsub.f32 0.0, %v1708_v54 }
 0xd34   : > { %v1710_v56 = vadd.f32 1.0, %v1709_v55  ;;  %v1722_v59 = vmul.f32 %v1721_v57, %v1708_v54 }
 0xd36   : > { %2688 = vrcp.f32 %v1710_v56  ;;  %v1723_v62 = vmul.f32 1.442695, %v1722_v59 }
 0xd38   : > { %2690 = vpow2.f32 %v1723_v62 }
 0xd40   : > { %v2689_v58 = vpop.eup %2688 }
 0xd41   : > { %v1712_v60 = vmul.f32 1.0614054, %v2689_v58 }
 0xd42   : > { %v2691_v9 = vpop.eup %2690 }
 0xd43   : > { %v2237_v61 = vadd.f32 -1.4531521, %v1712_v60 }
 0xd45   : > { %v1714_v0 = vmul.f32 %v2689_v58, %v2237_v61 }
 0xd47   : > { %v1715_v63 = vadd.f32 1.4214138, %v1714_v0 }
 0xd49   : > { %v1716_v1 = vmul.f32 %v2689_v58, %v1715_v63 }
 0xd4b   : > { %v2238_v2 = vadd.f32 -0.28449672, %v1716_v1 }
 0xd4d   : > { %v1718_v5 = vmul.f32 %v2689_v58, %v2238_v2 }
 0xd4f   : > { %v1719_v6 = vadd.f32 0.2548296, %v1718_v5 }
 0xd51   : > { %v1720_v8 = vmul.f32 %v2689_v58, %v1719_v6 }
 0xd53   : > { %v1725_v10 = vmul.f32 %v2691_v9, %v1720_v8 }
 0xd55   : > { %v1726_v11 = vsub.f32 1.0, %v1725_v10 }
 0xd57   : > { %v1728_v12 = vsub.f32 0.0, %v1726_v11 }
 0xd59   : > { %v1729_v13 = vsel %vm1727_vm10, %v1726_v11, %v1728_v12 }
 0xd5a   : > { %v1731_v15 = vadd.f32 1.0, %v1729_v13 }
 0xd5c   : > { %v1732_v16 = vmul.f32 %v1731_v15, %v1730_v14 }
 0xd5e   : > { %v1733_v17 = vpack.c.bf16 %v1732_v16, %v1732_v16 }
 0xd60   : > { %2353 = vmatmul.mubr.msk.bf16.vlgmr.msra.gmra.mrb[16].mxu1 %vm1773_vm11, %v1733_v17 }
 0xe33   : > { %v1811_v20 = vpop.f32.mrb[16].mxu1 }
 0xe34   : > { %v1812_v21 = vadd.f32 %v2239_v18, %v1811_v20  ;;  %v2354_v22 = vpop.f32.mrb[17].mxu1 }
 0xe35   : > { %v1814_v23 = vpop.f32.mrb[18].mxu1 }
 0xe36   : > { %v2355_v24 = vpop.f32.mrb[19].mxu1  ;;  %v1817_v25 = vadd.f32 %v1812_v21, %v1639_v42 }
 0xe38   : > { %v1820_v26 = vsel %vm992_vm1, %v1817_v25, 0.0 }
 0xe39   : > { %1821 = vadd.xlane.f32.xlu0 %v1820_v26 }
 0xec6   : > { %v1822_v27 = vpop.xlane.xlu0 %1821 }
 0xec7   : > { %v1823_v28 = vmul.f32 0.03125, %v1822_v27 }
 0xec9   : > { %v1824_v29 = vsub.f32 %v1817_v25, %v1823_v28 }
 0xecb   : > { %v1825_v30 = vmul.f32 %v1824_v29, %v1824_v29 }
 0xecd   : > { %v1826_v4 = vsel %vm992_vm1, %v1825_v30, 0.0 }
 0xece   : > { %1827 = vadd.xlane.f32.xlu1 %v1826_v4 }
 0xf5b   : > { %v1828_v7 = vpop.xlane.xlu1 %1827 }
 0xf5c   : > { %v1829_v31 = vmul.f32 0.03125, %v1828_v7 }
 0xf5e   : > { %v1830_v32 = vadd.f32 1e-12, %v1829_v31 }
 0xf60   : > { %2692 = vrsqrt.f32 %v1830_v32 }
 0xf6a   : > { %v2693_v33 = vpop.eup %2692 }
 0xf6b   : > { %v1832_v35 = vmul.f32 %v2693_v33, %v1824_v29 }
 0xf6d   : > { %v1839_v3 = vmul.f32 %v2245_v34, %v1832_v35 }
 0xf6f   : > { %v1846_v37 = vadd.f32 %v2246_v36, %v1839_v3 }
 0xf71   : > { %1847 = vst.msk [vmem:[%s4212_s1] sm:$0xff] %vm992_vm1, %v1846_v37 }
 0xf72   : > { %3297 = shalt.err (!%p3294_p4)
}
 0xf73   : > { %s3298_s2 = scalar_lea.hbm %s4275_s30, 128  ;;  %s3302_s4 = scalar_lea.hbm %s4439_s9, 256 }
 0xf74   : > { %p3299_p6 = scmp.ne.s32.totalorder %s4275_s30, %s3298_s2  ;;  %p3303_p12 = scmp.lt.u32.totalorder %s4275_s30, %s4439_s9 }
 0xf75   : > { %p3304_p11 = scmp.lt.u32.totalorder %s3302_s4, %s3298_s2  ;;  %p3306_p5 = scmp.lt.u32.totalorder %s3298_s2, %s4275_s30 }
 0xf76   : > { %p3300_p3 = pnand %p3299_p6, %p4440_p7 }
 0xf77   : > { %p3305_p0 = por %p3304_p11, %p3303_p12 }
 0xf78   : > { %p3301_p1 = pneg %p3300_p3 }
 0xf79   : > { %p3307_p10 = por %p3306_p5, %p3305_p0 }
 0xf7b   : > { %p3308_p13 = pnand %p3307_p10, %p3301_p1 }
 0xf7d   : > { %3311 = shalt.err (!%p3308_p13)
}
 0xf7e   : > { %2438 = dma.vmem_to_hbm [thread:$0]  (%p4440_p7), %s4277_s18, 128, %s4275_s30, %s1849_s0  }
 0xf7f PF: > { %s4441_s28 = sld [smem:[#allocation51_spill]]  ;;  %s4442_s16 = sld [smem:[#allocation56_spill]] }
 0xf80   : > { %p4443_p2 = scmp.ne.s32.totalorder %s4430_s5, 0 }
 0xf85   : > { %s1875_s25 = sand.u32 1, %s4441_s28   ;;  %p4444_p8 = scmp.ge.s32.totalorder %s4442_s16, 2 }
 0xf86   : > { %s1876_s3 = scalar_lea.sflag [#allocation7], %s1875_s25 }
 0xf87   : > { %p2506_p9 = pnand %p4444_p8, %p4443_p2 }
 0xf89   : > { %3397 = dma.done.wait (!%p2506_p9), %s1876_s3, 128  }
 0xf8a   : > { %3399 = vsyncadd (!%p2506_p9), %s1876_s3, 4294967168  ;;  %s47_s28 = sadd.s32 1, %s4442_s16   ;;  %s4445_s2 = sld [smem:[#allocation52_spill]] }
 0xf8b   : > { %p44_p4 = scmp.ge.s32.totalorder %s47_s28, 4   ;;  %s4446_s25 = sld [smem:[#allocation53_spill]] }
 0xf8c   : > { %s4447_s27 = sld [smem:[#allocation55_spill]]  ;;  %s4448_s3 = smov %s4450_s23 }
 0xf8d   :  { %46 = sbr.rel (!%p44_p4) target bundleno = 31 (0x1f), region = 272 }
 0xf94   :  { %1881 = vsyncpa [#allocation6], 1 }
 0xf95   :  { %1883 = vsyncpa [#allocation6 + $0x1], 1 }
 0xf96   :  { %1884 = vsyncpa [#allocation9], 1 }
 0xf97   :  { %1885 = vsyncpa [#allocation12], 1 }
 0xf98   :  { %1886 = vsyncpa [#allocation15], 1 }
 0xf99   :  { %1887 = vsyncpa [#allocation18], 1 }
 0xf9a   :  { %1888 = vsyncpa [#allocation21], 1 }
 0xf9b   :  { %1889 = vsyncpa [#allocation24], 1 }
 0xf9c   :  { %1890 = vsyncpa [#allocation27], 1 }
 0xf9d   :  { %1891 = vsyncpa [#allocation30], 1 }
 0xf9e   :  { %1892 = vsyncpa [#allocation33], 1 }
 0xf9f   :  { %1893 = vsyncpa [#allocation36], 1 }
 0xfa0   :  { %1894 = vsyncpa [#allocation7], 1 }
 0xfa1   :  { %1896 = vsyncpa [#allocation7 + $0x1], 1 }

</bundles_post_ra>
